<compile_context>
chip_gen: v6e
topology: v6e:2x2x1
jax: 0.10.0
libtpu: 0.0.40
codegen_flags: <defaults>
</compile_context>

<pallas_src>
import math

import jax
import jax.numpy as jnp
from jax.experimental import pallas as pl
from jax.experimental.pallas import tpu as pltpu

_VMEM_LIMIT = 32 * 1024 * 1024
_LRELU_SLOPE = 0.2
_IN_EPS = 1e-5


def _leaky_relu(y):
    return jnp.where(y > 0, y, _LRELU_SLOPE * y)


# ----------------------------------------------------------------------------- kernels
def _matmul_bias_lrelu_kernel(x_ref, w_ref, b_ref, o_ref):
    # Layer 1: o = leaky_relu(x @ w + b); bf16 operands, f32 accumulate, bf16 store.
    y = jnp.dot(x_ref[...], w_ref[...], preferred_element_type=jnp.float32) + b_ref[...]
    o_ref[...] = _leaky_relu(y).astype(o_ref.dtype)


def _conv_instnorm_lrelu_kernel(x_ref, w_ref, b_ref, o_ref, acc_ref):
    # Layers 2-4: grid = (N, K//tk).  Per-sample (HW, OC) accumulator resident in VMEM
    # across the K ("arbitrary") axis; InstanceNorm + LeakyReLU applied on the last step.
    k = pl.program_id(1)

    @pl.when(k == 0)
    def _init():
        acc_ref[...] = jnp.zeros_like(acc_ref)

    acc_ref[...] += jnp.dot(x_ref[...], w_ref[...], preferred_element_type=jnp.float32)

    @pl.when(k == pl.num_programs(1) - 1)
    def _finalize():
        y = acc_ref[...] + b_ref[...]                              # (HW, OC) f32
        # single-pass biased variance (torch InstanceNorm2d default, eps=1e-5, affine=False)
        mean = jnp.mean(y, axis=0, keepdims=True)
        var = jnp.maximum(jnp.mean(y * y, axis=0, keepdims=True) - mean * mean, 0.0)
        yn = (y - mean) * jax.lax.rsqrt(var + _IN_EPS)
        o_ref[...] = _leaky_relu(yn).astype(o_ref.dtype)


def _conv_avgpool_kernel(x_ref, w_ref, b_ref, o_ref, acc_ref):
    # Layer 5 (OC=1) fused with global average pool (exact by linearity):
    #   mean_hw(X @ w) + b == (mean_hw X) @ w + b
    k = pl.program_id(0)

    @pl.when(k == 0)
    def _init():
        acc_ref[...] = jnp.zeros_like(acc_ref)

    xs = jnp.sum(x_ref[...].astype(jnp.float32), axis=1)           # (N, tk)
    acc_ref[...] += jnp.dot(xs, w_ref[...].astype(jnp.float32),
                            preferred_element_type=jnp.float32)    # (N, 1)

    @pl.when(k == pl.num_programs(0) - 1)
    def _finalize():
        inv_hw = 1.0 / x_ref.shape[1]
        o_ref[...] = acc_ref[...] * inv_hw + b_ref[...]


# ----------------------------------------------------------------------------- wrappers
def _conv1_lrelu(x2d, w, b):
    """x2d: (M, K) bf16 patches; w: (K, OCp) bf16 (OC padded to 128); b: (OCp,) f32."""
    M, K = x2d.shape
    ocp = w.shape[1]
    tm = 256 if M % 256 == 0 else M
    return pl.pallas_call(
        _matmul_bias_lrelu_kernel,
        out_shape=jax.ShapeDtypeStruct((M, ocp), jnp.bfloat16),
        grid=(M // tm,),
        in_specs=[
            pl.BlockSpec((tm, K), lambda i: (i, 0)),
            pl.BlockSpec((K, ocp), lambda i: (0, 0)),
            pl.BlockSpec((1, ocp), lambda i: (0, 0)),
        ],
        out_specs=pl.BlockSpec((tm, ocp), lambda i: (i, 0)),
        compiler_params=pltpu.CompilerParams(
            dimension_semantics=("parallel",),
            vmem_limit_bytes=_VMEM_LIMIT),
    )(x2d, w, b.reshape(1, ocp))


def _conv_instnorm_lrelu(x3d, w, b):
    """x3d: (N, HW, K) bf16 patches; w: (K, OC) bf16; b: (OC,) f32 -> (N, HW, OC) bf16."""
    N, HW, K = x3d.shape
    oc = w.shape[1]
    tk = 512 if K % 512 == 0 else K
    return pl.pallas_call(
        _conv_instnorm_lrelu_kernel,
        out_shape=jax.ShapeDtypeStruct((N, HW, oc), jnp.bfloat16),
        grid=(N, K // tk),
        in_specs=[
            pl.BlockSpec((None, HW, tk), lambda n, k: (n, 0, k)),
            pl.BlockSpec((tk, oc), lambda n, k: (k, 0)),
            pl.BlockSpec((1, oc), lambda n, k: (0, 0)),
        ],
        out_specs=pl.BlockSpec((None, HW, oc), lambda n, k: (n, 0, 0)),
        scratch_shapes=[pltpu.VMEM((HW, oc), jnp.float32)],
        compiler_params=pltpu.CompilerParams(
            dimension_semantics=("parallel", "arbitrary"),
            vmem_limit_bytes=_VMEM_LIMIT),
    )(x3d, w, b.reshape(1, oc))


def _conv_avgpool(x3d, w, b):
    """x3d: (N, HW, K) bf16 patches; w: (K, 1) bf16; b: (1,) f32 -> (N, 1) f32."""
    N, HW, K = x3d.shape
    tk = 512 if K % 512 == 0 else K
    return pl.pallas_call(
        _conv_avgpool_kernel,
        out_shape=jax.ShapeDtypeStruct((N, 1), jnp.float32),
        grid=(K // tk,),
        in_specs=[
            pl.BlockSpec((N, HW, tk), lambda k: (0, 0, k)),
            pl.BlockSpec((tk, 1), lambda k: (k, 0)),
            pl.BlockSpec((1, 1), lambda k: (0, 0)),
        ],
        out_specs=pl.BlockSpec((N, 1), lambda k: (0, 0)),
        scratch_shapes=[pltpu.VMEM((N, 1), jnp.float32)],
        compiler_params=pltpu.CompilerParams(
            dimension_semantics=("arbitrary",),
            vmem_limit_bytes=_VMEM_LIMIT),
    )(x3d, w, b.reshape(1, 1))


# ----------------------------------------------------------------------------- glue
def _im2col(x_nhwc, kh, kw, stride, pad):
    """Extract conv patches (bf16). Returns (N, OH*OW, KH*KW*C), OH, OW."""
    x = jnp.pad(x_nhwc, ((0, 0), (pad, pad), (pad, pad), (0, 0)))
    N, H, W, C = x.shape
    oh = (H - kh) // stride + 1
    ow = (W - kw) // stride + 1
    patches = []
    for i in range(kh):
        for j in range(kw):
            patches.append(
                x[:, i: i + (oh - 1) * stride + 1: stride,
                     j: j + (ow - 1) * stride + 1: stride, :])
    p = jnp.stack(patches, axis=3)                 # (N, OH, OW, KH*KW, C)
    p = p.reshape(N, oh, ow, kh * kw * C)
    return p.reshape(N, oh * ow, kh * kw * C), oh, ow


def _prep_weight(w_oihw, pad_oc_to=None):
    """torch (OC, IC, KH, KW) -> (KH*KW*IC, OC[pad]) bf16 matching im2col order."""
    oc = w_oihw.shape[0]
    w = jnp.transpose(w_oihw, (2, 3, 1, 0)).reshape(-1, oc)
    if pad_oc_to is not None and pad_oc_to > oc:
        w = jnp.pad(w, ((0, 0), (0, pad_oc_to - oc)))
    return w.astype(jnp.bfloat16)


def _conv_init(key, oc, ic, k=4):
    """Deterministic init matching torch Conv2d default (uniform +-1/sqrt(fan_in))."""
    wk, bk = jax.random.split(key)
    bound = 1.0 / math.sqrt(ic * k * k)
    w = jax.random.uniform(wk, (oc, ic, k, k), jnp.float32, -bound, bound)
    b = jax.random.uniform(bk, (oc,), jnp.float32, -bound, bound)
    return w, b


def init_discriminator_params(key, conv_dim=32):
    ks = jax.random.split(key, 5)
    dims = [(conv_dim, 3), (conv_dim * 2, conv_dim), (conv_dim * 4, conv_dim * 2),
            (conv_dim * 8, conv_dim * 4), (1, conv_dim * 8)]
    oc1_pad = max(128, -(-conv_dim // 128) * 128)   # lane-dense layer-1 output
    params = {}
    for idx, ((oc, ic), k) in enumerate(zip(dims, ks), start=1):
        w, b = _conv_init(k, oc, ic)
        pad_to = oc1_pad if idx == 1 else None
        params[f"w{idx}"] = _prep_weight(w, pad_oc_to=pad_to)
        if pad_to is not None:
            b = jnp.pad(b, (0, pad_to - oc))
        params[f"b{idx}"] = b.astype(jnp.float32)
    return params


def discriminator_forward(x_nchw, params):
    """x_nchw: (N, 3, H, W) float32  ->  (N, 1) float32."""
    conv_dim = params["w2"].shape[0] // 16          # static: 16 taps * IC of layer 2
    x = jnp.transpose(x_nchw, (0, 2, 3, 1)).astype(jnp.bfloat16)   # NHWC bf16
    N = x.shape[0]

    # Layer 1: conv s2 + LeakyReLU (fused epilogue; OC padded to 128 lanes)
    cols, oh, ow = _im2col(x, 4, 4, 2, 1)
    y = _conv1_lrelu(cols.reshape(N * oh * ow, -1), params["w1"], params["b1"])
    x = y.reshape(N, oh, ow, -1)[..., :conv_dim]    # drop lane padding

    # Layers 2-4: conv + InstanceNorm + LeakyReLU (single fused kernel per layer)
    for idx, stride in ((2, 2), (3, 2), (4, 1)):
        cols, oh, ow = _im2col(x, 4, 4, stride, 1)
        y = _conv_instnorm_lrelu(cols, params[f"w{idx}"], params[f"b{idx}"])
        x = y.reshape(N, oh, ow, -1)

    # Layer 5 (OC=1) fused with the global average pool + flatten -> (N, 1)
    cols, _, _ = _im2col(x, 4, 4, 1, 1)
    return _conv_avgpool(cols, params["w5"], params["b5"])


if __name__ == "__main__":
    key = jax.random.PRNGKey(0)
    pkey, xkey = jax.random.split(key)

    params = init_discriminator_params(pkey, conv_dim=32)
    # 32x32 is the smallest spatial size that keeps every conv output non-degenerate.
    x = jax.random.normal(xkey, (2, 3, 32, 32), dtype=jnp.float32)

    fwd = jax.jit(discriminator_forward)
    out = fwd(x, params)
    jax.block_until_ready(out)

    assert out.shape == (2, 1), out.shape
    assert out.dtype == jnp.float32
    print("KERNEL_OK")
</pallas_src>

<mosaic_0001>
module attributes {stable_mosaic.version = 11 : i64} {
  func.func @_matmul_bias_lrelu_kernel(%arg0: i32, %arg1: memref<256x48xbf16, #tpu.memory_space<vmem>>, %arg2: memref<48x128xbf16, #tpu.memory_space<vmem>>, %arg3: memref<1x128xf32, #tpu.memory_space<vmem>>, %arg4: memref<256x128xbf16, #tpu.memory_space<vmem>>) attributes {dimension_semantics = [#tpu.dimension_semantics<parallel>], iteration_bounds = array<i64: 2>, scalar_prefetch = 0 : i64, scratch_operands = 0 : i64, tpu.core_type = #tpu.core_type<tc>, window_params = [{transform_indices = @transform_0, window_bounds = array<i64: 256, 48>}, {pipeline_mode = #tpu.pipeline_mode<synchronous>, transform_indices = @transform_1, window_bounds = array<i64: 48, 128>}, {pipeline_mode = #tpu.pipeline_mode<synchronous>, transform_indices = @transform_2, window_bounds = array<i64: 1, 128>}, {transform_indices = @transform_3, window_bounds = array<i64: 256, 128>}]} {
    %c0 = arith.constant 0 : index
    %c0_0 = arith.constant 0 : index
    %0 = vector.load %arg1[%c0, %c0_0] : memref<256x48xbf16, #tpu.memory_space<vmem>>, vector<256x48xbf16>
    %c0_1 = arith.constant 0 : index
    %c0_2 = arith.constant 0 : index
    %1 = vector.load %arg2[%c0_1, %c0_2] : memref<48x128xbf16, #tpu.memory_space<vmem>>, vector<48x128xbf16>
    %cst = arith.constant dense<0.000000e+00> : vector<256x128xf32>
    %2 = tpu.matmul %0, %1, %cst {dimension_numbers = #tpu.dot_dimension_numbers<[1], [0], [0], [1], [0, 0, 1, 1], [], []>} : vector<256x48xbf16>, vector<48x128xbf16>, vector<256x128xf32> -> vector<256x128xf32>
    %c0_3 = arith.constant 0 : index
    %c0_4 = arith.constant 0 : index
    %3 = vector.load %arg3[%c0_3, %c0_4] : memref<1x128xf32, #tpu.memory_space<vmem>>, vector<1x128xf32>
    %4 = vector.broadcast %3 : vector<1x128xf32> to vector<256x128xf32>
    %5 = arith.addf %2, %4 : vector<256x128xf32>
    %cst_5 = arith.constant 0.000000e+00 : f32
    %6 = vector.broadcast %cst_5 : f32 to vector<256x128xf32>
    %7 = arith.cmpf ogt, %5, %6 : vector<256x128xf32>
    %cst_6 = arith.constant 2.000000e-01 : f32
    %8 = vector.broadcast %cst_6 : f32 to vector<256x128xf32>
    %9 = arith.mulf %8, %5 : vector<256x128xf32>
    %10 = arith.select %7, %5, %9 : vector<256x128xi1>, vector<256x128xf32>
    %11 = arith.truncf %10 : vector<256x128xf32> to vector<256x128xbf16>
    %c0_7 = arith.constant 0 : index
    %c0_8 = arith.constant 0 : index
    %12 = vector.load %arg4[%c0_7, %c0_8] : memref<256x128xbf16, #tpu.memory_space<vmem>>, vector<256x128xbf16>
    tpu.vector_store %arg4[%c0_7, %c0_8], %11 {strides = array<i32>} : memref<256x128xbf16, #tpu.memory_space<vmem>>, vector<256x128xbf16>,
    return
  }
  func.func @transform_0(%arg0: i32) -> (i32, i32) {
    %c0_i32 = arith.constant 0 : i32
    %c0_i32_0 = arith.constant 0 : i32
    return %arg0, %c0_i32 : i32, i32
  }
  func.func @transform_1(%arg0: i32) -> (i32, i32) {
    %c0_i32 = arith.constant 0 : i32
    %c0_i32_0 = arith.constant 0 : i32
    %c0_i32_1 = arith.constant 0 : i32
    return %c0_i32, %c0_i32_0 : i32, i32
  }
  func.func @transform_2(%arg0: i32) -> (i32, i32) {
    %c0_i32 = arith.constant 0 : i32
    %c0_i32_0 = arith.constant 0 : i32
    %c0_i32_1 = arith.constant 0 : i32
    return %c0_i32, %c0_i32_0 : i32, i32
  }
  func.func @transform_3(%arg0: i32) -> (i32, i32) {
    %c0_i32 = arith.constant 0 : i32
    %c0_i32_0 = arith.constant 0 : i32
    return %arg0, %c0_i32 : i32, i32
  }
}

module attributes {stable_mosaic.version = 11 : i64} {
  func.func @_conv_instnorm_lrelu_kernel(%arg0: i32, %arg1: i32, %arg2: memref<1x64x512xbf16, #tpu.memory_space<vmem>>, %arg3: memref<512x64xbf16, #tpu.memory_space<vmem>>, %arg4: memref<1x64xf32, #tpu.memory_space<vmem>>, %arg5: memref<1x64x64xbf16, #tpu.memory_space<vmem>>, %arg6: memref<64x64xf32, #tpu.memory_space<vmem>>) attributes {dimension_semantics = [#tpu.dimension_semantics<parallel>, #tpu.dimension_semantics<arbitrary>], iteration_bounds = array<i64: 2, 1>, scalar_prefetch = 0 : i64, scratch_operands = 1 : i64, tpu.core_type = #tpu.core_type<tc>, window_params = [{transform_indices = @transform_0, window_bounds = array<i64: 1, 64, 512>}, {transform_indices = @transform_1, window_bounds = array<i64: 512, 64>}, {pipeline_mode = #tpu.pipeline_mode<synchronous>, transform_indices = @transform_2, window_bounds = array<i64: 1, 64>}, {transform_indices = @transform_3, window_bounds = array<i64: 1, 64, 64>}]} {
    %c0_i32 = arith.constant 0 : i32
    %0 = arith.cmpi eq, %arg1, %c0_i32 : i32
    %1 = arith.extui %0 : i1 to i32
    %c0_i32_0 = arith.constant 0 : i32
    %2 = arith.cmpi ne, %1, %c0_i32_0 : i32
    scf.if %2 {
      %cst_11 = arith.constant 0.000000e+00 : f32
      %13 = vector.broadcast %cst_11 : f32 to vector<64x64xf32>
      %c0_12 = arith.constant 0 : index
      %c0_13 = arith.constant 0 : index
      %14 = vector.load %arg6[%c0_12, %c0_13] : memref<64x64xf32, #tpu.memory_space<vmem>>, vector<64x64xf32>
      tpu.vector_store %arg6[%c0_12, %c0_13], %13 {strides = array<i32>} : memref<64x64xf32, #tpu.memory_space<vmem>>, vector<64x64xf32>,
    } else {
    }
    %c0 = arith.constant 0 : index
    %c0_1 = arith.constant 0 : index
    %3 = vector.load %arg6[%c0, %c0_1] : memref<64x64xf32, #tpu.memory_space<vmem>>, vector<64x64xf32>
    %c0_2 = arith.constant 0 : index
    %c0_3 = arith.constant 0 : index
    %c0_4 = arith.constant 0 : index
    %4 = vector.load %arg2[%c0_2, %c0_3, %c0_4] : memref<1x64x512xbf16, #tpu.memory_space<vmem>>, vector<1x64x512xbf16>
    %5 = vector.shape_cast %4 : vector<1x64x512xbf16> to vector<64x512xbf16>
    %c0_5 = arith.constant 0 : index
    %c0_6 = arith.constant 0 : index
    %6 = vector.load %arg3[%c0_5, %c0_6] : memref<512x64xbf16, #tpu.memory_space<vmem>>, vector<512x64xbf16>
    %cst = arith.constant dense<0.000000e+00> : vector<64x64xf32>
    %7 = tpu.matmul %5, %6, %cst {dimension_numbers = #tpu.dot_dimension_numbers<[1], [0], [0], [1], [0, 0, 1, 1], [], []>} : vector<64x512xbf16>, vector<512x64xbf16>, vector<64x64xf32> -> vector<64x64xf32>
    %8 = arith.addf %3, %7 : vector<64x64xf32>
    %c0_7 = arith.constant 0 : index
    %c0_8 = arith.constant 0 : index
    %9 = vector.load %arg6[%c0_7, %c0_8] : memref<64x64xf32, #tpu.memory_space<vmem>>, vector<64x64xf32>
    tpu.vector_store %arg6[%c0_7, %c0_8], %8 {strides = array<i32>} : memref<64x64xf32, #tpu.memory_space<vmem>>, vector<64x64xf32>,
    %c0_i32_9 = arith.constant 0 : i32
    %10 = arith.cmpi eq, %arg1, %c0_i32_9 : i32
    %11 = arith.extui %10 : i1 to i32
    %c0_i32_10 = arith.constant 0 : i32
    %12 = arith.cmpi ne, %11, %c0_i32_10 : i32
    scf.if %12 {
      %c0_11 = arith.constant 0 : index
      %c0_12 = arith.constant 0 : index
      %13 = vector.load %arg6[%c0_11, %c0_12] : memref<64x64xf32, #tpu.memory_space<vmem>>, vector<64x64xf32>
      %c0_13 = arith.constant 0 : index
      %c0_14 = arith.constant 0 : index
      %14 = vector.load %arg4[%c0_13, %c0_14] : memref<1x64xf32, #tpu.memory_space<vmem>>, vector<1x64xf32>
      %15 = vector.broadcast %14 : vector<1x64xf32> to vector<64x64xf32>
      %16 = arith.addf %13, %15 : vector<64x64xf32>
      %cst_15 = arith.constant dense<0.000000e+00> : vector<64xf32>
      %17 = vector.multi_reduction <add>, %16, %cst_15 [0] : vector<64x64xf32> to vector<64xf32>
      %18 = vector.shape_cast %17 : vector<64xf32> to vector<1x64xf32>
      %cst_16 = arith.constant 6.400000e+01 : f32
      %19 = vector.broadcast %cst_16 : f32 to vector<1x64xf32>
      %20 = arith.divf %18, %19 : vector<1x64xf32>
      %21 = arith.mulf %16, %16 : vector<64x64xf32>
      %cst_17 = arith.constant dense<0.000000e+00> : vector<64xf32>
      %22 = vector.multi_reduction <add>, %21, %cst_17 [0] : vector<64x64xf32> to vector<64xf32>
      %23 = vector.shape_cast %22 : vector<64xf32> to vector<1x64xf32>
      %cst_18 = arith.constant 6.400000e+01 : f32
      %24 = vector.broadcast %cst_18 : f32 to vector<1x64xf32>
      %25 = arith.divf %23, %24 : vector<1x64xf32>
      %26 = arith.mulf %20, %20 : vector<1x64xf32>
      %27 = arith.subf %25, %26 : vector<1x64xf32>
      %cst_19 = arith.constant 0.000000e+00 : f32
      %28 = vector.broadcast %cst_19 : f32 to vector<1x64xf32>
      %29 = arith.maximumf %27, %28 : vector<1x64xf32>
      %30 = vector.broadcast %20 : vector<1x64xf32> to vector<64x64xf32>
      %31 = arith.subf %16, %30 : vector<64x64xf32>
      %cst_20 = arith.constant 9.99999974E-6 : f32
      %32 = vector.broadcast %cst_20 : f32 to vector<1x64xf32>
      %33 = arith.addf %29, %32 : vector<1x64xf32>
      %34 = math.rsqrt %33 : vector<1x64xf32>
      %35 = vector.broadcast %34 : vector<1x64xf32> to vector<64x64xf32>
      %36 = arith.mulf %31, %35 : vector<64x64xf32>
      %cst_21 = arith.constant 0.000000e+00 : f32
      %37 = vector.broadcast %cst_21 : f32 to vector<64x64xf32>
      %38 = arith.cmpf ogt, %36, %37 : vector<64x64xf32>
      %cst_22 = arith.constant 2.000000e-01 : f32
      %39 = vector.broadcast %cst_22 : f32 to vector<64x64xf32>
      %40 = arith.mulf %39, %36 : vector<64x64xf32>
      %41 = arith.select %38, %36, %40 : vector<64x64xi1>, vector<64x64xf32>
      %42 = arith.truncf %41 : vector<64x64xf32> to vector<64x64xbf16>
      %c0_23 = arith.constant 0 : index
      %c0_24 = arith.constant 0 : index
      %c0_25 = arith.constant 0 : index
      %43 = vector.load %arg5[%c0_23, %c0_24, %c0_25] : memref<1x64x64xbf16, #tpu.memory_space<vmem>>, vector<1x64x64xbf16>
      %44 = vector.shape_cast %43 : vector<1x64x64xbf16> to vector<64x64xbf16>
      %45 = vector.shape_cast %42 : vector<64x64xbf16> to vector<1x64x64xbf16>
      tpu.vector_store %arg5[%c0_23, %c0_24, %c0_25], %45 {strides = array<i32>} : memref<1x64x64xbf16, #tpu.memory_space<vmem>>, vector<1x64x64xbf16>,
    } else {
    }
    return
  }
  func.func @transform_0(%arg0: i32, %arg1: i32) -> (i32, i32, i32) {
    %c0_i32 = arith.constant 0 : i32
    %c0_i32_0 = arith.constant 0 : i32
    return %arg0, %c0_i32, %arg1 : i32, i32, i32
  }
  func.func @transform_1(%arg0: i32, %arg1: i32) -> (i32, i32) {
    %c0_i32 = arith.constant 0 : i32
    %c0_i32_0 = arith.constant 0 : i32
    return %arg1, %c0_i32 : i32, i32
  }
  func.func @transform_2(%arg0: i32, %arg1: i32) -> (i32, i32) {
    %c0_i32 = arith.constant 0 : i32
    %c0_i32_0 = arith.constant 0 : i32
    %c0_i32_1 = arith.constant 0 : i32
    return %c0_i32, %c0_i32_0 : i32, i32
  }
  func.func @transform_3(%arg0: i32, %arg1: i32) -> (i32, i32, i32) {
    %c0_i32 = arith.constant 0 : i32
    %c0_i32_0 = arith.constant 0 : i32
    %c0_i32_1 = arith.constant 0 : i32
    return %arg0, %c0_i32, %c0_i32_0 : i32, i32, i32
  }
}

module attributes {stable_mosaic.version = 11 : i64} {
  func.func @_conv_instnorm_lrelu_kernel(%arg0: i32, %arg1: i32, %arg2: memref<1x16x512xbf16, #tpu.memory_space<vmem>>, %arg3: memref<512x128xbf16, #tpu.memory_space<vmem>>, %arg4: memref<1x128xf32, #tpu.memory_space<vmem>>, %arg5: memref<1x16x128xbf16, #tpu.memory_space<vmem>>, %arg6: memref<16x128xf32, #tpu.memory_space<vmem>>) attributes {dimension_semantics = [#tpu.dimension_semantics<parallel>, #tpu.dimension_semantics<arbitrary>], iteration_bounds = array<i64: 2, 2>, scalar_prefetch = 0 : i64, scratch_operands = 1 : i64, tpu.core_type = #tpu.core_type<tc>, window_params = [{transform_indices = @transform_0, window_bounds = array<i64: 1, 16, 512>}, {transform_indices = @transform_1, window_bounds = array<i64: 512, 128>}, {pipeline_mode = #tpu.pipeline_mode<synchronous>, transform_indices = @transform_2, window_bounds = array<i64: 1, 128>}, {transform_indices = @transform_3, window_bounds = array<i64: 1, 16, 128>}]} {
    %c0_i32 = arith.constant 0 : i32
    %0 = arith.cmpi eq, %arg1, %c0_i32 : i32
    %1 = arith.extui %0 : i1 to i32
    %c0_i32_0 = arith.constant 0 : i32
    %2 = arith.cmpi ne, %1, %c0_i32_0 : i32
    scf.if %2 {
      %cst_10 = arith.constant 0.000000e+00 : f32
      %13 = vector.broadcast %cst_10 : f32 to vector<16x128xf32>
      %c0_11 = arith.constant 0 : index
      %c0_12 = arith.constant 0 : index
      %14 = vector.load %arg6[%c0_11, %c0_12] : memref<16x128xf32, #tpu.memory_space<vmem>>, vector<16x128xf32>
      tpu.vector_store %arg6[%c0_11, %c0_12], %13 {strides = array<i32>} : memref<16x128xf32, #tpu.memory_space<vmem>>, vector<16x128xf32>,
    } else {
    }
    %c0 = arith.constant 0 : index
    %c0_1 = arith.constant 0 : index
    %3 = vector.load %arg6[%c0, %c0_1] : memref<16x128xf32, #tpu.memory_space<vmem>>, vector<16x128xf32>
    %c0_2 = arith.constant 0 : index
    %c0_3 = arith.constant 0 : index
    %c0_4 = arith.constant 0 : index
    %4 = vector.load %arg2[%c0_2, %c0_3, %c0_4] : memref<1x16x512xbf16, #tpu.memory_space<vmem>>, vector<1x16x512xbf16>
    %5 = vector.shape_cast %4 : vector<1x16x512xbf16> to vector<16x512xbf16>
    %c0_5 = arith.constant 0 : index
    %c0_6 = arith.constant 0 : index
    %6 = vector.load %arg3[%c0_5, %c0_6] : memref<512x128xbf16, #tpu.memory_space<vmem>>, vector<512x128xbf16>
    %cst = arith.constant dense<0.000000e+00> : vector<16x128xf32>
    %7 = tpu.matmul %5, %6, %cst {dimension_numbers = #tpu.dot_dimension_numbers<[1], [0], [0], [1], [0, 0, 1, 1], [], []>} : vector<16x512xbf16>, vector<512x128xbf16>, vector<16x128xf32> -> vector<16x128xf32>
    %8 = arith.addf %3, %7 : vector<16x128xf32>
    %c0_7 = arith.constant 0 : index
    %c0_8 = arith.constant 0 : index
    %9 = vector.load %arg6[%c0_7, %c0_8] : memref<16x128xf32, #tpu.memory_space<vmem>>, vector<16x128xf32>
    tpu.vector_store %arg6[%c0_7, %c0_8], %8 {strides = array<i32>} : memref<16x128xf32, #tpu.memory_space<vmem>>, vector<16x128xf32>,
    %c1_i32 = arith.constant 1 : i32
    %10 = arith.cmpi eq, %arg1, %c1_i32 : i32
    %11 = arith.extui %10 : i1 to i32
    %c0_i32_9 = arith.constant 0 : i32
    %12 = arith.cmpi ne, %11, %c0_i32_9 : i32
    scf.if %12 {
      %c0_10 = arith.constant 0 : index
      %c0_11 = arith.constant 0 : index
      %13 = vector.load %arg6[%c0_10, %c0_11] : memref<16x128xf32, #tpu.memory_space<vmem>>, vector<16x128xf32>
      %c0_12 = arith.constant 0 : index
      %c0_13 = arith.constant 0 : index
      %14 = vector.load %arg4[%c0_12, %c0_13] : memref<1x128xf32, #tpu.memory_space<vmem>>, vector<1x128xf32>
      %15 = vector.broadcast %14 : vector<1x128xf32> to vector<16x128xf32>
      %16 = arith.addf %13, %15 : vector<16x128xf32>
      %cst_14 = arith.constant dense<0.000000e+00> : vector<128xf32>
      %17 = vector.multi_reduction <add>, %16, %cst_14 [0] : vector<16x128xf32> to vector<128xf32>
      %18 = vector.shape_cast %17 : vector<128xf32> to vector<1x128xf32>
      %cst_15 = arith.constant 1.600000e+01 : f32
      %19 = vector.broadcast %cst_15 : f32 to vector<1x128xf32>
      %20 = arith.divf %18, %19 : vector<1x128xf32>
      %21 = arith.mulf %16, %16 : vector<16x128xf32>
      %cst_16 = arith.constant dense<0.000000e+00> : vector<128xf32>
      %22 = vector.multi_reduction <add>, %21, %cst_16 [0] : vector<16x128xf32> to vector<128xf32>
      %23 = vector.shape_cast %22 : vector<128xf32> to vector<1x128xf32>
      %cst_17 = arith.constant 1.600000e+01 : f32
      %24 = vector.broadcast %cst_17 : f32 to vector<1x128xf32>
      %25 = arith.divf %23, %24 : vector<1x128xf32>
      %26 = arith.mulf %20, %20 : vector<1x128xf32>
      %27 = arith.subf %25, %26 : vector<1x128xf32>
      %cst_18 = arith.constant 0.000000e+00 : f32
      %28 = vector.broadcast %cst_18 : f32 to vector<1x128xf32>
      %29 = arith.maximumf %27, %28 : vector<1x128xf32>
      %30 = vector.broadcast %20 : vector<1x128xf32> to vector<16x128xf32>
      %31 = arith.subf %16, %30 : vector<16x128xf32>
      %cst_19 = arith.constant 9.99999974E-6 : f32
      %32 = vector.broadcast %cst_19 : f32 to vector<1x128xf32>
      %33 = arith.addf %29, %32 : vector<1x128xf32>
      %34 = math.rsqrt %33 : vector<1x128xf32>
      %35 = vector.broadcast %34 : vector<1x128xf32> to vector<16x128xf32>
      %36 = arith.mulf %31, %35 : vector<16x128xf32>
      %cst_20 = arith.constant 0.000000e+00 : f32
      %37 = vector.broadcast %cst_20 : f32 to vector<16x128xf32>
      %38 = arith.cmpf ogt, %36, %37 : vector<16x128xf32>
      %cst_21 = arith.constant 2.000000e-01 : f32
      %39 = vector.broadcast %cst_21 : f32 to vector<16x128xf32>
      %40 = arith.mulf %39, %36 : vector<16x128xf32>
      %41 = arith.select %38, %36, %40 : vector<16x128xi1>, vector<16x128xf32>
      %42 = arith.truncf %41 : vector<16x128xf32> to vector<16x128xbf16>
      %c0_22 = arith.constant 0 : index
      %c0_23 = arith.constant 0 : index
      %c0_24 = arith.constant 0 : index
      %43 = vector.load %arg5[%c0_22, %c0_23, %c0_24] : memref<1x16x128xbf16, #tpu.memory_space<vmem>>, vector<1x16x128xbf16>
      %44 = vector.shape_cast %43 : vector<1x16x128xbf16> to vector<16x128xbf16>
      %45 = vector.shape_cast %42 : vector<16x128xbf16> to vector<1x16x128xbf16>
      tpu.vector_store %arg5[%c0_22, %c0_23, %c0_24], %45 {strides = array<i32>} : memref<1x16x128xbf16, #tpu.memory_space<vmem>>, vector<1x16x128xbf16>,
    } else {
    }
    return
  }
  func.func @transform_0(%arg0: i32, %arg1: i32) -> (i32, i32, i32) {
    %c0_i32 = arith.constant 0 : i32
    %c0_i32_0 = arith.constant 0 : i32
    return %arg0, %c0_i32, %arg1 : i32, i32, i32
  }
  func.func @transform_1(%arg0: i32, %arg1: i32) -> (i32, i32) {
    %c0_i32 = arith.constant 0 : i32
    %c0_i32_0 = arith.constant 0 : i32
    return %arg1, %c0_i32 : i32, i32
  }
  func.func @transform_2(%arg0: i32, %arg1: i32) -> (i32, i32) {
    %c0_i32 = arith.constant 0 : i32
    %c0_i32_0 = arith.constant 0 : i32
    %c0_i32_1 = arith.constant 0 : i32
    return %c0_i32, %c0_i32_0 : i32, i32
  }
  func.func @transform_3(%arg0: i32, %arg1: i32) -> (i32, i32, i32) {
    %c0_i32 = arith.constant 0 : i32
    %c0_i32_0 = arith.constant 0 : i32
    %c0_i32_1 = arith.constant 0 : i32
    return %arg0, %c0_i32, %c0_i32_0 : i32, i32, i32
  }
}

module attributes {stable_mosaic.version = 11 : i64} {
  func.func @_conv_instnorm_lrelu_kernel(%arg0: i32, %arg1: i32, %arg2: memref<1x9x512xbf16, #tpu.memory_space<vmem>>, %arg3: memref<512x256xbf16, #tpu.memory_space<vmem>>, %arg4: memref<1x256xf32, #tpu.memory_space<vmem>>, %arg5: memref<1x9x256xbf16, #tpu.memory_space<vmem>>, %arg6: memref<9x256xf32, #tpu.memory_space<vmem>>) attributes {dimension_semantics = [#tpu.dimension_semantics<parallel>, #tpu.dimension_semantics<arbitrary>], iteration_bounds = array<i64: 2, 4>, scalar_prefetch = 0 : i64, scratch_operands = 1 : i64, tpu.core_type = #tpu.core_type<tc>, window_params = [{transform_indices = @transform_0, window_bounds = array<i64: 1, 9, 512>}, {transform_indices = @transform_1, window_bounds = array<i64: 512, 256>}, {pipeline_mode = #tpu.pipeline_mode<synchronous>, transform_indices = @transform_2, window_bounds = array<i64: 1, 256>}, {transform_indices = @transform_3, window_bounds = array<i64: 1, 9, 256>}]} {
    %c0_i32 = arith.constant 0 : i32
    %0 = arith.cmpi eq, %arg1, %c0_i32 : i32
    %1 = arith.extui %0 : i1 to i32
    %c0_i32_0 = arith.constant 0 : i32
    %2 = arith.cmpi ne, %1, %c0_i32_0 : i32
    scf.if %2 {
      %cst_10 = arith.constant 0.000000e+00 : f32
      %13 = vector.broadcast %cst_10 : f32 to vector<9x256xf32>
      %c0_11 = arith.constant 0 : index
      %c0_12 = arith.constant 0 : index
      %14 = vector.load %arg6[%c0_11, %c0_12] : memref<9x256xf32, #tpu.memory_space<vmem>>, vector<9x256xf32>
      tpu.vector_store %arg6[%c0_11, %c0_12], %13 {strides = array<i32>} : memref<9x256xf32, #tpu.memory_space<vmem>>, vector<9x256xf32>,
    } else {
    }
    %c0 = arith.constant 0 : index
    %c0_1 = arith.constant 0 : index
    %3 = vector.load %arg6[%c0, %c0_1] : memref<9x256xf32, #tpu.memory_space<vmem>>, vector<9x256xf32>
    %c0_2 = arith.constant 0 : index
    %c0_3 = arith.constant 0 : index
    %c0_4 = arith.constant 0 : index
    %4 = vector.load %arg2[%c0_2, %c0_3, %c0_4] : memref<1x9x512xbf16, #tpu.memory_space<vmem>>, vector<1x9x512xbf16>
    %5 = vector.shape_cast %4 : vector<1x9x512xbf16> to vector<9x512xbf16>
    %c0_5 = arith.constant 0 : index
    %c0_6 = arith.constant 0 : index
    %6 = vector.load %arg3[%c0_5, %c0_6] : memref<512x256xbf16, #tpu.memory_space<vmem>>, vector<512x256xbf16>
    %cst = arith.constant dense<0.000000e+00> : vector<9x256xf32>
    %7 = tpu.matmul %5, %6, %cst {dimension_numbers = #tpu.dot_dimension_numbers<[1], [0], [0], [1], [0, 0, 1, 1], [], []>} : vector<9x512xbf16>, vector<512x256xbf16>, vector<9x256xf32> -> vector<9x256xf32>
    %8 = arith.addf %3, %7 : vector<9x256xf32>
    %c0_7 = arith.constant 0 : index
    %c0_8 = arith.constant 0 : index
    %9 = vector.load %arg6[%c0_7, %c0_8] : memref<9x256xf32, #tpu.memory_space<vmem>>, vector<9x256xf32>
    tpu.vector_store %arg6[%c0_7, %c0_8], %8 {strides = array<i32>} : memref<9x256xf32, #tpu.memory_space<vmem>>, vector<9x256xf32>,
    %c3_i32 = arith.constant 3 : i32
    %10 = arith.cmpi eq, %arg1, %c3_i32 : i32
    %11 = arith.extui %10 : i1 to i32
    %c0_i32_9 = arith.constant 0 : i32
    %12 = arith.cmpi ne, %11, %c0_i32_9 : i32
    scf.if %12 {
      %c0_10 = arith.constant 0 : index
      %c0_11 = arith.constant 0 : index
      %13 = vector.load %arg6[%c0_10, %c0_11] : memref<9x256xf32, #tpu.memory_space<vmem>>, vector<9x256xf32>
      %c0_12 = arith.constant 0 : index
      %c0_13 = arith.constant 0 : index
      %14 = vector.load %arg4[%c0_12, %c0_13] : memref<1x256xf32, #tpu.memory_space<vmem>>, vector<1x256xf32>
      %15 = vector.broadcast %14 : vector<1x256xf32> to vector<9x256xf32>
      %16 = arith.addf %13, %15 : vector<9x256xf32>
      %cst_14 = arith.constant dense<0.000000e+00> : vector<256xf32>
      %17 = vector.multi_reduction <add>, %16, %cst_14 [0] : vector<9x256xf32> to vector<256xf32>
      %18 = vector.shape_cast %17 : vector<256xf32> to vector<1x256xf32>
      %cst_15 = arith.constant 9.000000e+00 : f32
      %19 = vector.broadcast %cst_15 : f32 to vector<1x256xf32>
      %20 = arith.divf %18, %19 : vector<1x256xf32>
      %21 = arith.mulf %16, %16 : vector<9x256xf32>
      %cst_16 = arith.constant dense<0.000000e+00> : vector<256xf32>
      %22 = vector.multi_reduction <add>, %21, %cst_16 [0] : vector<9x256xf32> to vector<256xf32>
      %23 = vector.shape_cast %22 : vector<256xf32> to vector<1x256xf32>
      %cst_17 = arith.constant 9.000000e+00 : f32
      %24 = vector.broadcast %cst_17 : f32 to vector<1x256xf32>
      %25 = arith.divf %23, %24 : vector<1x256xf32>
      %26 = arith.mulf %20, %20 : vector<1x256xf32>
      %27 = arith.subf %25, %26 : vector<1x256xf32>
      %cst_18 = arith.constant 0.000000e+00 : f32
      %28 = vector.broadcast %cst_18 : f32 to vector<1x256xf32>
      %29 = arith.maximumf %27, %28 : vector<1x256xf32>
      %30 = vector.broadcast %20 : vector<1x256xf32> to vector<9x256xf32>
      %31 = arith.subf %16, %30 : vector<9x256xf32>
      %cst_19 = arith.constant 9.99999974E-6 : f32
      %32 = vector.broadcast %cst_19 : f32 to vector<1x256xf32>
      %33 = arith.addf %29, %32 : vector<1x256xf32>
      %34 = math.rsqrt %33 : vector<1x256xf32>
      %35 = vector.broadcast %34 : vector<1x256xf32> to vector<9x256xf32>
      %36 = arith.mulf %31, %35 : vector<9x256xf32>
      %cst_20 = arith.constant 0.000000e+00 : f32
      %37 = vector.broadcast %cst_20 : f32 to vector<9x256xf32>
      %38 = arith.cmpf ogt, %36, %37 : vector<9x256xf32>
      %cst_21 = arith.constant 2.000000e-01 : f32
      %39 = vector.broadcast %cst_21 : f32 to vector<9x256xf32>
      %40 = arith.mulf %39, %36 : vector<9x256xf32>
      %41 = arith.select %38, %36, %40 : vector<9x256xi1>, vector<9x256xf32>
      %42 = arith.truncf %41 : vector<9x256xf32> to vector<9x256xbf16>
      %c0_22 = arith.constant 0 : index
      %c0_23 = arith.constant 0 : index
      %c0_24 = arith.constant 0 : index
      %43 = vector.load %arg5[%c0_22, %c0_23, %c0_24] : memref<1x9x256xbf16, #tpu.memory_space<vmem>>, vector<1x9x256xbf16>
      %44 = vector.shape_cast %43 : vector<1x9x256xbf16> to vector<9x256xbf16>
      %45 = vector.shape_cast %42 : vector<9x256xbf16> to vector<1x9x256xbf16>
      tpu.vector_store %arg5[%c0_22, %c0_23, %c0_24], %45 {strides = array<i32>} : memref<1x9x256xbf16, #tpu.memory_space<vmem>>, vector<1x9x256xbf16>,
    } else {
    }
    return
  }
  func.func @transform_0(%arg0: i32, %arg1: i32) -> (i32, i32, i32) {
    %c0_i32 = arith.constant 0 : i32
    %c0_i32_0 = arith.constant 0 : i32
    return %arg0, %c0_i32, %arg1 : i32, i32, i32
  }
  func.func @transform_1(%arg0: i32, %arg1: i32) -> (i32, i32) {
    %c0_i32 = arith.constant 0 : i32
    %c0_i32_0 = arith.constant 0 : i32
    return %arg1, %c0_i32 : i32, i32
  }
  func.func @transform_2(%arg0: i32, %arg1: i32) -> (i32, i32) {
    %c0_i32 = arith.constant 0 : i32
    %c0_i32_0 = arith.constant 0 : i32
    %c0_i32_1 = arith.constant 0 : i32
    return %c0_i32, %c0_i32_0 : i32, i32
  }
  func.func @transform_3(%arg0: i32, %arg1: i32) -> (i32, i32, i32) {
    %c0_i32 = arith.constant 0 : i32
    %c0_i32_0 = arith.constant 0 : i32
    %c0_i32_1 = arith.constant 0 : i32
    return %arg0, %c0_i32, %c0_i32_0 : i32, i32, i32
  }
}

module attributes {stable_mosaic.version = 11 : i64} {
  func.func @_conv_avgpool_kernel(%arg0: i32, %arg1: memref<2x4x512xbf16, #tpu.memory_space<vmem>>, %arg2: memref<512x1xbf16, #tpu.memory_space<vmem>>, %arg3: memref<1x1xf32, #tpu.memory_space<vmem>>, %arg4: memref<2x1xf32, #tpu.memory_space<vmem>>, %arg5: memref<2x1xf32, #tpu.memory_space<vmem>>) attributes {dimension_semantics = [#tpu.dimension_semantics<arbitrary>], iteration_bounds = array<i64: 8>, scalar_prefetch = 0 : i64, scratch_operands = 1 : i64, tpu.core_type = #tpu.core_type<tc>, window_params = [{transform_indices = @transform_0, window_bounds = array<i64: 2, 4, 512>}, {transform_indices = @transform_1, window_bounds = array<i64: 512, 1>}, {pipeline_mode = #tpu.pipeline_mode<synchronous>, transform_indices = @transform_2, window_bounds = array<i64: 1, 1>}, {pipeline_mode = #tpu.pipeline_mode<synchronous>, transform_indices = @transform_3, window_bounds = array<i64: 2, 1>}]} {
    %c0_i32 = arith.constant 0 : i32
    %0 = arith.cmpi eq, %arg0, %c0_i32 : i32
    %1 = arith.extui %0 : i1 to i32
    %c0_i32_0 = arith.constant 0 : i32
    %2 = arith.cmpi ne, %1, %c0_i32_0 : i32
    scf.if %2 {
      %cst_11 = arith.constant 0.000000e+00 : f32
      %15 = vector.broadcast %cst_11 : f32 to vector<2x1xf32>
      %c0_12 = arith.constant 0 : index
      %c0_13 = arith.constant 0 : index
      %16 = vector.load %arg5[%c0_12, %c0_13] : memref<2x1xf32, #tpu.memory_space<vmem>>, vector<2x1xf32>
      tpu.vector_store %arg5[%c0_12, %c0_13], %15 {strides = array<i32>} : memref<2x1xf32, #tpu.memory_space<vmem>>, vector<2x1xf32>,
    } else {
    }
    %c0 = arith.constant 0 : index
    %c0_1 = arith.constant 0 : index
    %c0_2 = arith.constant 0 : index
    %3 = vector.load %arg1[%c0, %c0_1, %c0_2] : memref<2x4x512xbf16, #tpu.memory_space<vmem>>, vector<2x4x512xbf16>
    %4 = arith.extf %3 : vector<2x4x512xbf16> to vector<2x4x512xf32>
    %cst = arith.constant dense<0.000000e+00> : vector<2x512xf32>
    %5 = vector.multi_reduction <add>, %4, %cst [1] : vector<2x4x512xf32> to vector<2x512xf32>
    %c0_3 = arith.constant 0 : index
    %c0_4 = arith.constant 0 : index
    %6 = vector.load %arg5[%c0_3, %c0_4] : memref<2x1xf32, #tpu.memory_space<vmem>>, vector<2x1xf32>
    %c0_5 = arith.constant 0 : index
    %c0_6 = arith.constant 0 : index
    %7 = vector.load %arg2[%c0_5, %c0_6] : memref<512x1xbf16, #tpu.memory_space<vmem>>, vector<512x1xbf16>
    %8 = arith.extf %7 : vector<512x1xbf16> to vector<512x1xf32>
    %cst_7 = arith.constant dense<0.000000e+00> : vector<2x1xf32>
    %9 = tpu.matmul %5, %8, %cst_7 {dimension_numbers = #tpu.dot_dimension_numbers<[1], [0], [0], [1], [0, 0, 1, 1], [], []>} : vector<2x512xf32>, vector<512x1xf32>, vector<2x1xf32> -> vector<2x1xf32>
    %10 = arith.addf %6, %9 : vector<2x1xf32>
    %c0_8 = arith.constant 0 : index
    %c0_9 = arith.constant 0 : index
    %11 = vector.load %arg5[%c0_8, %c0_9] : memref<2x1xf32, #tpu.memory_space<vmem>>, vector<2x1xf32>
    tpu.vector_store %arg5[%c0_8, %c0_9], %10 {strides = array<i32>} : memref<2x1xf32, #tpu.memory_space<vmem>>, vector<2x1xf32>,
    %c7_i32 = arith.constant 7 : i32
    %12 = arith.cmpi eq, %arg0, %c7_i32 : i32
    %13 = arith.extui %12 : i1 to i32
    %c0_i32_10 = arith.constant 0 : i32
    %14 = arith.cmpi ne, %13, %c0_i32_10 : i32
    scf.if %14 {
      %c0_11 = arith.constant 0 : index
      %c0_12 = arith.constant 0 : index
      %15 = vector.load %arg5[%c0_11, %c0_12] : memref<2x1xf32, #tpu.memory_space<vmem>>, vector<2x1xf32>
      %cst_13 = arith.constant 2.500000e-01 : f32
      %16 = vector.broadcast %cst_13 : f32 to vector<2x1xf32>
      %17 = arith.mulf %15, %16 : vector<2x1xf32>
      %c0_14 = arith.constant 0 : index
      %c0_15 = arith.constant 0 : index
      %18 = vector.load %arg3[%c0_14, %c0_15] : memref<1x1xf32, #tpu.memory_space<vmem>>, vector<1x1xf32>
      %19 = vector.broadcast %18 : vector<1x1xf32> to vector<2x1xf32>
      %20 = arith.addf %17, %19 : vector<2x1xf32>
      %c0_16 = arith.constant 0 : index
      %c0_17 = arith.constant 0 : index
      %21 = vector.load %arg4[%c0_16, %c0_17] : memref<2x1xf32, #tpu.memory_space<vmem>>, vector<2x1xf32>
      tpu.vector_store %arg4[%c0_16, %c0_17], %20 {strides = array<i32>} : memref<2x1xf32, #tpu.memory_space<vmem>>, vector<2x1xf32>,
    } else {
    }
    return
  }
  func.func @transform_0(%arg0: i32) -> (i32, i32, i32) {
    %c0_i32 = arith.constant 0 : i32
    %c0_i32_0 = arith.constant 0 : i32
    %c0_i32_1 = arith.constant 0 : i32
    return %c0_i32, %c0_i32_0, %arg0 : i32, i32, i32
  }
  func.func @transform_1(%arg0: i32) -> (i32, i32) {
    %c0_i32 = arith.constant 0 : i32
    %c0_i32_0 = arith.constant 0 : i32
    return %arg0, %c0_i32 : i32, i32
  }
  func.func @transform_2(%arg0: i32) -> (i32, i32) {
    %c0_i32 = arith.constant 0 : i32
    %c0_i32_0 = arith.constant 0 : i32
    %c0_i32_1 = arith.constant 0 : i32
    return %c0_i32, %c0_i32_0 : i32, i32
  }
  func.func @transform_3(%arg0: i32) -> (i32, i32) {
    %c0_i32 = arith.constant 0 : i32
    %c0_i32_0 = arith.constant 0 : i32
    %c0_i32_1 = arith.constant 0 : i32
    return %c0_i32, %c0_i32_0 : i32, i32
  }
}

</mosaic_0001>

<bundles_post_ra>
// kernel: discriminator_forward.5
= control target key start
LH: loop header
LB: loop body
LE: loop exit
PB: predicated region body
PF: predicated region fallthrough
CT: control target
= control target key end

     0   :  { %s1164_s12 = smov 0   ;;  %s1290_s0 = inlined_call_operand.vmem [shape: bf16[512,48], index: 0, kind: input, shape index: {}]   ;;  %s1291_s1 = inlined_call_operand.vmem [shape: bf16[48,128], index: 1, kind: input, shape index: {}]   ;;  %s1292_s2 = inlined_call_operand.vmem [shape: f32[1,128], index: 2, kind: input, shape index: {}]   ;;  %s1293_s3 = inlined_call_operand.vmem [shape: bf16[512,128], index: 3, kind: output, shape index: {}]  }
   0x1 LB: > { %s840_s13 = sadd.s32 4294967295, %s1142_s12   ;;  %p844_p0 = scmp.ge.s32.totalorder %s1142_s12, 1  ;;  %s1142_s12 = sphi %s1164_s12, %s13_s12  }
   0x2   : > { %p138_p1 = scmp.lt.s32.totalorder %s1142_s12, 3 }
   0x4   : > { %p139_p2 = pnand %p844_p0, %p138_p1 }
   0x5   : > { %s845_s16 = sshll.u32 (!%p139_p2), %s840_s13, 5 }
   0x6   : > { %142 = sbr.rel (%p139_p2) target bundleno = 259 (0x103), region = 32  ;;  %p163_p3 = scmp.lt.s32.totalorder (!%p139_p2), %s845_s16, 63 }
   0xb   : > { %v1117_v0 = vld [vmem:[%s1291_s1 + $0x10] sm:$0xff]   ;;  %v1118_v1 = vld [vmem:[%s1291_s1 + $0x8] sm:$0xff]   ;;  %s1295_s16 = smov (!%p163_p3, %s845_s16), 63  ;;  %v1119_v2 = vld [vmem:[%s1291_s1] sm:$0xff]   ;;  %vm318_vm0 = vcmask 392192  }
   0xc   : > { %1065 = vmatprep.subr.bf16.mxu0 %v1117_v0  ;;  %1103 = vmatprep.subr.bf16.mxu1 %v1117_v0  ;;  %s846_s21 = sshll.u32 %s1295_s16, 2  ;;  %v1226_v19 = vld [vmem:[%s1292_s2] ss:$0 sm:$0xff] }
   0xd   : > { %1066 = vmatpush3.bf16.msra.mxu0 %v1117_v0  ;;  %1106 = vmatpush3.bf16.msra.mxu1 %v1117_v0  ;;  %s1189_s24 = scalar_lea.vmem %s1290_s0, %s846_s21  ;;  %s1241_s29 = scalar_lea.vmem %s1293_s3, %s846_s21 }
   0xe   : > { %1067 = vmatprep.subr.bf16.mxu0 %v1118_v1  ;;  %1104 = vmatprep.subr.bf16.mxu1 %v1118_v1  ;;  %v1120_v3 = vld [vmem:[%s1189_s24] sm:$0xff]   ;;  %v1122_v5 = vld [vmem:[%s1189_s24 + $0x8] sm:$0xff]   ;;  %v1124_v7 = vld [vmem:[%s1189_s24 + $0x10] sm:$0xff]  }
   0xf   : > { %v1121_v4 = vld [vmem:[%s1189_s24 + $0x40] sm:$0xff]   ;;  %1071 = vmatprep.mubr.msk.bf16.mxu0 %vm318_vm0, %v1120_v3  ;;  %v1123_v6 = vld [vmem:[%s1189_s24 + $0x48] sm:$0xff]   ;;  %v1125_v8 = vld [vmem:[%s1189_s24 + $0x50] sm:$0xff]  }
  0x10   : > { %1087 = vmatprep.mubr.msk.bf16.mxu1 %vm318_vm0, %v1121_v4  ;;  %v1126_v9 = vld [vmem:[%s1189_s24 + $0x18] sm:$0xff]   ;;  %v1128_v11 = vld [vmem:[%s1189_s24 + $0x20] sm:$0xff]   ;;  %v1130_v13 = vld [vmem:[%s1189_s24 + $0x28] sm:$0xff]  }
  0x11   : > { %1068 = vmatpush3.bf16.msra.mxu0 %v1118_v1  ;;  %1107 = vmatpush3.bf16.msra.mxu1 %v1118_v1  ;;  %v1127_v10 = vld [vmem:[%s1189_s24 + $0x58] sm:$0xff]   ;;  %v1129_v12 = vld [vmem:[%s1189_s24 + $0x60] sm:$0xff]   ;;  %v1131_v14 = vld [vmem:[%s1189_s24 + $0x68] sm:$0xff]  }
  0x12   : > { %1069 = vmatprep.subr.bf16.mxu0 %v1119_v2  ;;  %1105 = vmatprep.subr.bf16.mxu1 %v1119_v2  ;;  %v1132_v15 = vld [vmem:[%s1189_s24 + $0x30] sm:$0xff]   ;;  %v1134_v17 = vld [vmem:[%s1189_s24 + $0x38] sm:$0xff]  }
  0x13   : > { %v1133_v16 = vld [vmem:[%s1189_s24 + $0x70] sm:$0xff]   ;;  %v1135_v18 = vld [vmem:[%s1189_s24 + $0x78] sm:$0xff]  }
  0x15   : > { %1070 = vmatpush3.bf16.msra.mxu0 %v1119_v2  ;;  %1108 = vmatpush3.bf16.msra.mxu1 %v1119_v2 }
  0x18   : > { %1072 = vmatmul.mubr.msk.bf16.vlgmr.msra.gmra.mxu0 %vm318_vm0, %v1122_v5  ;;  %1088 = vmatmul.mubr.msk.bf16.vlgmr.msra.gmra.mxu1 %vm318_vm0, %v1123_v6 }
  0x19   : > { %1075 = vmatprep.mubr.msk.bf16.mxu0 %vm318_vm0, %v1124_v7  ;;  %1091 = vmatprep.mubr.msk.bf16.mxu1 %vm318_vm0, %v1125_v8 }
  0x20   : > { %1076 = vmatmul.mubr.msk.bf16.gmra.mxu0 %vm318_vm0, %v1126_v9  ;;  %1092 = vmatmul.mubr.msk.bf16.gmra.mxu1 %vm318_vm0, %v1127_v10 }
  0x21   : > { %1079 = vmatprep.mubr.msk.bf16.mxu0 %vm318_vm0, %v1128_v11  ;;  %1095 = vmatprep.mubr.msk.bf16.mxu1 %vm318_vm0, %v1129_v12 }
  0x28   : > { %1080 = vmatmul.mubr.msk.bf16.gmra.mxu0 %vm318_vm0, %v1130_v13  ;;  %1096 = vmatmul.mubr.msk.bf16.gmra.mxu1 %vm318_vm0, %v1131_v14 }
  0x29   : > { %1083 = vmatprep.mubr.msk.bf16.mxu0 %vm318_vm0, %v1132_v15  ;;  %1099 = vmatprep.mubr.msk.bf16.mxu1 %vm318_vm0, %v1133_v16 }
  0x30   : > { %1084 = vmatmul.mubr.msk.bf16.gmra.mxu0 %vm318_vm0, %v1134_v17  ;;  %1100 = vmatmul.mubr.msk.bf16.gmra.mxu1 %vm318_vm0, %v1135_v18 }
  0xd8   : > { %v1073_v20 = vpop.f32.mrf.mxu0  ;;  %v1089_v21 = vpop.f32.mrf.mxu1 }
  0xd9   : > { %v410_v22 = vadd.f32 %v1073_v20, %v1226_v19  ;;  %v474_v23 = vadd.f32 %v1089_v21, %v1226_v19 }
  0xda   : > { %v401_v24 = vpop.f32.mrf.mxu0  ;;  %v465_v25 = vpop.f32.mrf.mxu1 }
  0xdb   : > { %vm530_vm1 = vcmp.gt.f32.partialorder %v410_v22, 0.0  ;;  %v562_v26 = vmul.f32 0.2, %v410_v22  ;;  %vm546_vm2 = vcmp.gt.f32.partialorder %v474_v23, 0.0  ;;  %v578_v27 = vmul.f32 0.2, %v474_v23 }
  0xdc   : > { %v402_v28 = vadd.f32 %v1226_v19, %v401_v24  ;;  %v466_v29 = vadd.f32 %v1226_v19, %v465_v25  ;;  %v1074_v30 = vpop.f32.mrf.mxu0  ;;  %v1090_v31 = vpop.f32.mrf.mxu1 }
  0xdd   : > { %v594_v32 = vsel %vm530_vm1, %v410_v22, %v562_v26  ;;  %v413_v33 = vadd.f32 %v1074_v30, %v1226_v19  ;;  %v477_v34 = vadd.f32 %v1090_v31, %v1226_v19  ;;  %v610_v35 = vsel %vm546_vm2, %v474_v23, %v578_v27 }
  0xde   : > { %vm528_vm3 = vcmp.gt.f32.partialorder %v402_v28, 0.0  ;;  %v560_v36 = vmul.f32 0.2, %v402_v28  ;;  %vm544_vm4 = vcmp.gt.f32.partialorder %v466_v29, 0.0  ;;  %v404_v37 = vpop.f32.mrf.mxu0  ;;  %v468_v38 = vpop.f32.mrf.mxu1  ;;  %v576_v42 = vmul.f32 0.2, %v466_v29 }
  0xdf   : > { %vm531_vm5 = vcmp.gt.f32.partialorder %v413_v33, 0.0  ;;  %v563_v39 = vmul.f32 0.2, %v413_v33  ;;  %vm547_vm6 = vcmp.gt.f32.partialorder %v477_v34, 0.0  ;;  %v579_v40 = vmul.f32 0.2, %v477_v34 }
  0xe0   : > { %v592_v41 = vsel %vm528_vm3, %v402_v28, %v560_v36  ;;  %v405_v43 = vadd.f32 %v1226_v19, %v404_v37  ;;  %v469_v44 = vadd.f32 %v1226_v19, %v468_v38  ;;  %v1077_v45 = vpop.f32.mrf.mxu0  ;;  %v1093_v46 = vpop.f32.mrf.mxu1  ;;  %v608_v58 = vsel %vm544_vm4, %v466_v29, %v576_v42 }
  0xe1   : > { %v595_v47 = vsel %vm531_vm5, %v413_v33, %v563_v39  ;;  %v611_v48 = vsel %vm547_vm6, %v477_v34, %v579_v40  ;;  %v426_v49 = vadd.f32 %v1077_v45, %v1226_v19  ;;  %v490_v50 = vadd.f32 %v1093_v46, %v1226_v19 }
  0xe2   : > { %v959_v51 = vpack.c.bf16 %v595_v47, %v594_v32  ;;  %v999_v52 = vpack.c.bf16 %v611_v48, %v610_v35  ;;  %vm529_vm7 = vcmp.gt.f32.partialorder %v405_v43, 0.0  ;;  %v561_v53 = vmul.f32 0.2, %v405_v43  ;;  %v417_v54 = vpop.f32.mrf.mxu0  ;;  %v481_v55 = vpop.f32.mrf.mxu1 }
  0xe3   : > { %vm545_vm8 = vcmp.gt.f32.partialorder %v469_v44, 0.0  ;;  %v577_v56 = vmul.f32 0.2, %v469_v44  ;;  %vm534_vm9 = vcmp.gt.f32.partialorder %v426_v49, 0.0  ;;  %v566_v57 = vmul.f32 0.2, %v426_v49 }
  0xe4   : > { %1031 = vst [vmem:[%s1241_s29 + $0x8] sm:$0xff] %v959_v51   ;;  %1039 = vst [vmem:[%s1241_s29 + $0x48] sm:$0xff] %v999_v52   ;;  %v593_v59 = vsel %vm529_vm7, %v405_v43, %v561_v53  ;;  %v582_v60 = vmul.f32 0.2, %v490_v50  ;;  %v418_v61 = vadd.f32 %v1226_v19, %v417_v54  ;;  %v1078_v62 = vpop.f32.mrf.mxu0  ;;  %v1094_v63 = vpop.f32.mrf.mxu1  ;;  %vm550_vm10 = vcmp.gt.f32.partialorder %v490_v50, 0.0 }
  0xe5   : > { %v954_v0 = vpack.c.bf16 %v593_v59, %v592_v41  ;;  %v609_v1 = vsel %vm545_vm8, %v469_v44, %v577_v56  ;;  %v482_v2 = vadd.f32 %v1226_v19, %v481_v55  ;;  %v598_v4 = vsel %vm534_vm9, %v426_v49, %v566_v57 }
  0xe6   : > { %v994_v3 = vpack.c.bf16 %v609_v1, %v608_v58  ;;  %vm532_vm11 = vcmp.gt.f32.partialorder %v418_v61, 0.0  ;;  %v564_v5 = vmul.f32 0.2, %v418_v61  ;;  %v420_v6 = vpop.f32.mrf.mxu0  ;;  %v484_v7 = vpop.f32.mrf.mxu1  ;;  %v429_v9 = vadd.f32 %v1078_v62, %v1226_v19 }
  0xe7   : > { %955 = vst [vmem:[%s1241_s29] sm:$0xff] %v954_v0   ;;  %vm548_vm12 = vcmp.gt.f32.partialorder %v482_v2, 0.0  ;;  %v580_v8 = vmul.f32 0.2, %v482_v2  ;;  %v493_v10 = vadd.f32 %v1094_v63, %v1226_v19  ;;  %v614_v11 = vsel %vm550_vm10, %v490_v50, %v582_v60 }
  0xe8   : > { %1038 = vst [vmem:[%s1241_s29 + $0x40] sm:$0xff] %v994_v3   ;;  %v596_v12 = vsel %vm532_vm11, %v418_v61, %v564_v5  ;;  %v421_v13 = vadd.f32 %v1226_v19, %v420_v6  ;;  %v485_v14 = vadd.f32 %v1226_v19, %v484_v7  ;;  %v1081_v15 = vpop.f32.mrf.mxu0  ;;  %v1097_v16 = vpop.f32.mrf.mxu1  ;;  %vm535_vm13 = vcmp.gt.f32.partialorder %v429_v9, 0.0 }
  0xe9   : > { %v612_v17 = vsel %vm548_vm12, %v482_v2, %v580_v8  ;;  %v567_v18 = vmul.f32 0.2, %v429_v9  ;;  %vm551_vm14 = vcmp.gt.f32.partialorder %v493_v10, 0.0  ;;  %v583_v20 = vmul.f32 0.2, %v493_v10 }
  0xea   : > { %vm533_vm15 = vcmp.gt.f32.partialorder %v421_v13, 0.0  ;;  %v565_v21 = vmul.f32 0.2, %v421_v13  ;;  %vm549_vm0 = vcmp.gt.f32.partialorder %v485_v14, 0.0  ;;  %v433_v22 = vpop.f32.mrf.mxu0  ;;  %v497_v23 = vpop.f32.mrf.mxu1  ;;  %v581_v25 = vmul.f32 0.2, %v485_v14 }
  0xeb   : > { %v599_v24 = vsel %vm535_vm13, %v429_v9, %v567_v18  ;;  %v442_v26 = vadd.f32 %v1081_v15, %v1226_v19  ;;  %v506_v27 = vadd.f32 %v1097_v16, %v1226_v19  ;;  %v615_v29 = vsel %vm551_vm14, %v493_v10, %v583_v20 }
  0xec   : > { %v969_v28 = vpack.c.bf16 %v599_v24, %v598_v4  ;;  %v597_v30 = vsel %vm533_vm15, %v421_v13, %v565_v21  ;;  %v434_v31 = vadd.f32 %v1226_v19, %v433_v22  ;;  %v1082_v32 = vpop.f32.mrf.mxu0  ;;  %v1098_v33 = vpop.f32.mrf.mxu1  ;;  %v1009_v34 = vpack.c.bf16 %v615_v29, %v614_v11 }
  0xed   : > { %v964_v35 = vpack.c.bf16 %v597_v30, %v596_v12  ;;  %v613_v36 = vsel %vm549_vm0, %v485_v14, %v581_v25  ;;  %vm538_vm1 = vcmp.gt.f32.partialorder %v442_v26, 0.0  ;;  %v570_v38 = vmul.f32 0.2, %v442_v26 }
  0xee   : > { %1033 = vst [vmem:[%s1241_s29 + $0x18] sm:$0xff] %v969_v28   ;;  %v1004_v37 = vpack.c.bf16 %v613_v36, %v612_v17  ;;  %vm554_vm2 = vcmp.gt.f32.partialorder %v506_v27, 0.0  ;;  %v586_v39 = vmul.f32 0.2, %v506_v27  ;;  %v436_v40 = vpop.f32.mrf.mxu0  ;;  %v500_v41 = vpop.f32.mrf.mxu1  ;;  %1041 = vst [vmem:[%s1241_s29 + $0x58] sm:$0xff] %v1009_v34   ;;  %vm536_vm3 = vcmp.gt.f32.partialorder %v434_v31, 0.0 }
  0xef   : > { %1032 = vst [vmem:[%s1241_s29 + $0x10] sm:$0xff] %v964_v35   ;;  %v568_v42 = vmul.f32 0.2, %v434_v31  ;;  %v498_v43 = vadd.f32 %v1226_v19, %v497_v23  ;;  %v445_v44 = vadd.f32 %v1082_v32, %v1226_v19  ;;  %v602_v45 = vsel %vm538_vm1, %v442_v26, %v570_v38 }
  0xf0   : > { %1040 = vst [vmem:[%s1241_s29 + $0x50] sm:$0xff] %v1004_v37   ;;  %v509_v46 = vadd.f32 %v1098_v33, %v1226_v19  ;;  %v437_v47 = vadd.f32 %v1226_v19, %v436_v40  ;;  %v1085_v48 = vpop.f32.mrf.mxu0  ;;  %v1101_v49 = vpop.f32.mrf.mxu1  ;;  %v618_v50 = vsel %vm554_vm2, %v506_v27, %v586_v39  ;;  %v501_v58 = vadd.f32 %v1226_v19, %v500_v41 }
  0xf1   : > { %v600_v51 = vsel %vm536_vm3, %v434_v31, %v568_v42  ;;  %vm552_vm4 = vcmp.gt.f32.partialorder %v498_v43, 0.0  ;;  %vm539_vm5 = vcmp.gt.f32.partialorder %v445_v44, 0.0  ;;  %v571_v52 = vmul.f32 0.2, %v445_v44 }
  0xf2   : > { %vm555_vm6 = vcmp.gt.f32.partialorder %v509_v46, 0.0  ;;  %v587_v53 = vmul.f32 0.2, %v509_v46  ;;  %vm537_vm7 = vcmp.gt.f32.partialorder %v437_v47, 0.0  ;;  %v449_v54 = vpop.f32.mrf.mxu0  ;;  %v513_v55 = vpop.f32.mrf.mxu1  ;;  %v584_v56 = vmul.f32 0.2, %v498_v43 }
  0xf3   : > { %v569_v57 = vmul.f32 0.2, %v437_v47  ;;  %v458_v59 = vadd.f32 %v1085_v48, %v1226_v19  ;;  %v603_v60 = vsel %vm539_vm5, %v445_v44, %v571_v52  ;;  %v522_v62 = vadd.f32 %v1101_v49, %v1226_v19 }
  0xf4   : > { %v619_v61 = vsel %vm555_vm6, %v509_v46, %v587_v53  ;;  %v450_v63 = vadd.f32 %v1226_v19, %v449_v54  ;;  %v1086_v0 = vpop.f32.mrf.mxu0  ;;  %v1102_v1 = vpop.f32.mrf.mxu1  ;;  %v979_v2 = vpack.c.bf16 %v603_v60, %v602_v45  ;;  %vm553_vm8 = vcmp.gt.f32.partialorder %v501_v58, 0.0 }
  0xf5   : > { %v1019_v3 = vpack.c.bf16 %v619_v61, %v618_v50  ;;  %v601_v4 = vsel %vm537_vm7, %v437_v47, %v569_v57  ;;  %v585_v6 = vmul.f32 0.2, %v501_v58  ;;  %v574_v7 = vmul.f32 0.2, %v458_v59 }
  0xf6   : > { %v974_v5 = vpack.c.bf16 %v601_v4, %v600_v51  ;;  %v616_v8 = vsel %vm552_vm4, %v498_v43, %v584_v56  ;;  %1035 = vst [vmem:[%s1241_s29 + $0x28] sm:$0xff] %v979_v2   ;;  %vm542_vm9 = vcmp.gt.f32.partialorder %v458_v59, 0.0  ;;  %v590_v10 = vmul.f32 0.2, %v522_v62  ;;  %v452_v13 = vpop.f32.mrf.mxu0  ;;  %v516_v14 = vpop.f32.mrf.mxu1 }
  0xf7   : > { %1043 = vst [vmem:[%s1241_s29 + $0x68] sm:$0xff] %v1019_v3   ;;  %v617_v9 = vsel %vm553_vm8, %v501_v58, %v585_v6  ;;  %v514_v11 = vadd.f32 %v1226_v19, %v513_v55  ;;  %v461_v12 = vadd.f32 %v1086_v0, %v1226_v19  ;;  %vm558_vm10 = vcmp.gt.f32.partialorder %v522_v62, 0.0 }
  0xf8   : > { %1034 = vst [vmem:[%s1241_s29 + $0x20] sm:$0xff] %v974_v5   ;;  %v1014_v15 = vpack.c.bf16 %v617_v9, %v616_v8  ;;  %vm540_vm11 = vcmp.gt.f32.partialorder %v450_v63, 0.0  ;;  %v525_v16 = vadd.f32 %v1102_v1, %v1226_v19  ;;  %v606_v17 = vsel %vm542_vm9, %v458_v59, %v574_v7 }
  0xf9   : > { %v572_v18 = vmul.f32 0.2, %v450_v63  ;;  %vm543_vm12 = vcmp.gt.f32.partialorder %v461_v12, 0.0  ;;  %v575_v20 = vmul.f32 0.2, %v461_v12  ;;  %v453_v22 = vadd.f32 %v1226_v19, %v452_v13 }
  0xfa   : > { %1042 = vst [vmem:[%s1241_s29 + $0x60] sm:$0xff] %v1014_v15   ;;  %vm559_vm13 = vcmp.gt.f32.partialorder %v525_v16, 0.0  ;;  %v591_v21 = vmul.f32 0.2, %v525_v16  ;;  %v517_v23 = vadd.f32 %v1226_v19, %v516_v14  ;;  %v622_v24 = vsel %vm558_vm10, %v522_v62, %v590_v10 }
  0xfb   : > { %vm556_vm14 = vcmp.gt.f32.partialorder %v514_v11, 0.0  ;;  %v588_v25 = vmul.f32 0.2, %v514_v11  ;;  %v607_v26 = vsel %vm543_vm12, %v461_v12, %v575_v20  ;;  %vm541_vm15 = vcmp.gt.f32.partialorder %v453_v22, 0.0 }
  0xfc   : > { %v989_v27 = vpack.c.bf16 %v607_v26, %v606_v17  ;;  %v623_v28 = vsel %vm559_vm13, %v525_v16, %v591_v21  ;;  %v573_v29 = vmul.f32 0.2, %v453_v22  ;;  %vm557_vm0 = vcmp.gt.f32.partialorder %v517_v23, 0.0 }
  0xfd   : > { %v1029_v30 = vpack.c.bf16 %v623_v28, %v622_v24  ;;  %v589_v31 = vmul.f32 0.2, %v517_v23  ;;  %v604_v32 = vsel %vm540_vm11, %v450_v63, %v572_v18  ;;  %v620_v34 = vsel %vm556_vm14, %v514_v11, %v588_v25 }
  0xfe   : > { %1037 = vst [vmem:[%s1241_s29 + $0x38] sm:$0xff] %v989_v27   ;;  %v605_v33 = vsel %vm541_vm15, %v453_v22, %v573_v29 }
  0xff   : > { %1045 = vst [vmem:[%s1241_s29 + $0x78] sm:$0xff] %v1029_v30   ;;  %v984_v19 = vpack.c.bf16 %v605_v33, %v604_v32  ;;  %v621_v35 = vsel %vm557_vm0, %v517_v23, %v589_v31 }
 0x100   : > { %v1024_v36 = vpack.c.bf16 %v621_v35, %v620_v34 }
 0x101   : > { %1036 = vst [vmem:[%s1241_s29 + $0x30] sm:$0xff] %v984_v19  }
 0x102   : > { %1044 = vst [vmem:[%s1241_s29 + $0x70] sm:$0xff] %v1024_v36  }
 0x103 PF: > { %s13_s12 = sadd.s32 1, %s1142_s12  }
 0x104   : > { %p10_p4 = scmp.ge.s32.totalorder %s13_s12, 4  }
 0x106   :  { %12 = sbr.rel (!%p10_p4) target bundleno = 1 (0x1), region = 62 }

// kernel: discriminator_forward.6
= control target key start
LH: loop header
LB: loop body
LE: loop exit
PB: predicated region body
PF: predicated region fallthrough
CT: control target
= control target key end

     0   :  { %s1279_s12 = smov 0   ;;  %s1281_s13 = smov 0   ;;  %s1531_s0 = inlined_call_operand.vmem [shape: bf16[2,64,512], index: 0, kind: input, shape index: {}]   ;;  %s1532_s1 = inlined_call_operand.vmem [shape: bf16[512,64], index: 1, kind: input, shape index: {}]   ;;  %s1533_s2 = inlined_call_operand.vmem [shape: f32[1,64], index: 2, kind: input, shape index: {}]   ;;  %s1534_s3 = inlined_call_operand.vmem [shape: bf16[2,64,64], index: 3, kind: output, shape index: {}]  }
   0x1   :  { %s1283_s14 = smov 0  }
   0x2 LB: > { %s25_s15 = sadd.s32 1, %s1252_s13  ;;  %p997_p0 = scmp.ge.s32.totalorder %s1256_s14, 1  ;;  %s1256_s14 = sphi %s1283_s14, %s13_s14   ;;  %s1252_s13 = sphi %s1281_s13, %s1536_s13   ;;  %s1248_s12 = sphi %s1279_s12, %s1535_s12  }
   0x3   : > { %p27_p1 = scmp.ge.s32.totalorder %s25_s15, 2  ;;  %p167_p2 = scmp.lt.s32.totalorder %s1256_s14, 3 }
   0x5   : > { %s1538_s15 = smov (%p27_p1, %s25_s15), 0  ;;  %p168_p3 = pnand %p997_p0, %p167_p2 }
   0x6   : > { %p201_p4 = scmp.lt.s32.totalorder (!%p168_p3), %s1248_s12, 1 }
   0x7   : > { %171 = sbr.rel (%p168_p3) target bundleno = 339 (0x153), region = 32 }
   0xc   : > { %v1176_v0 = vld [vmem:[%s1532_s1 + $0x78] sm:$0xff]   ;;  %v1180_v4 = vld [vmem:[%s1532_s1 + $0x70] sm:$0xff]   ;;  %v1184_v8 = vld [vmem:[%s1532_s1 + $0x68] sm:$0xff]   ;;  %s1540_s12 = smov (!%p201_p4, %s1248_s12), 1  ;;  %vm226_vm0 = vcmask 523264   ;;  %v1258_v48 = vmov 0.0  }
   0xd   : > { %v1177_v1 = vld [vmem:[%s1532_s1 + $0xf8] sm:$0xff]   ;;  %1071 = vmatprep.subr.bf16.mxu0 %v1176_v0  ;;  %v1181_v5 = vld [vmem:[%s1532_s1 + $0xf0] sm:$0xff]   ;;  %v1185_v9 = vld [vmem:[%s1532_s1 + $0xe8] sm:$0xff]   ;;  %s1061_s24 = sshll.u32 %s1540_s12, 7  ;;  %227 = vst.msk [vmem:[#allocation2] sm:$0xff] %vm226_vm0, %v1258_v48  ;;  %vm898_vm1 = vcmask 519168  }
   0xe   : > { %v1178_v2 = vld [vmem:[%s1532_s1 + $0x38] sm:$0xff]   ;;  %1111 = vmatprep.subr.bf16.mxu1 %v1177_v1  ;;  %v1182_v6 = vld [vmem:[%s1532_s1 + $0x30] sm:$0xff]   ;;  %v1186_v10 = vld [vmem:[%s1532_s1 + $0x28] sm:$0xff]   ;;  %s1397_s6 = scalar_lea.vmem %s1531_s0, %s1061_s24  ;;  %228 = vst.msk [vmem:[#allocation2 + $0x8] sm:$0xff] %vm226_vm0, %v1258_v48  ;;  %s1062_s17 = sshll.u32 %s1540_s12, 5 }
   0xf   : > { %v1179_v3 = vld [vmem:[%s1532_s1 + $0xb8] sm:$0xff]   ;;  %1072 = vmatpush3.bf16.msra.mxu0 %v1178_v2  ;;  %v1183_v7 = vld [vmem:[%s1532_s1 + $0xb0] sm:$0xff]   ;;  %v1187_v11 = vld [vmem:[%s1532_s1 + $0xa8] sm:$0xff]   ;;  %229 = vst.msk [vmem:[#allocation2 + $0x10] sm:$0xff] %vm226_vm0, %v1258_v48  ;;  %s220_s12 = scalar_lea.vmem %s1534_s3, %s1062_s17 }
  0x10   : > { %1112 = vmatpush3.bf16.msra.mxu1 %v1179_v3  ;;  %1073 = vmatprep.subr.bf16.mxu0 %v1180_v4  ;;  %v1188_v12 = vld [vmem:[%s1532_s1 + $0x60] sm:$0xff]   ;;  %v1192_v16 = vld [vmem:[%s1532_s1 + $0x58] sm:$0xff]   ;;  %v1196_v20 = vld [vmem:[%s1532_s1 + $0x50] sm:$0xff]   ;;  %230 = vst.msk [vmem:[#allocation2 + $0x18] sm:$0xff] %vm226_vm0, %v1258_v48 }
  0x11   : > { %1113 = vmatprep.subr.bf16.mxu1 %v1181_v5  ;;  %v1189_v13 = vld [vmem:[%s1532_s1 + $0xe0] sm:$0xff]   ;;  %v1193_v17 = vld [vmem:[%s1532_s1 + $0xd8] sm:$0xff]   ;;  %v1197_v21 = vld [vmem:[%s1532_s1 + $0xd0] sm:$0xff]   ;;  %231 = vst.msk [vmem:[#allocation2 + $0x20] sm:$0xff] %vm226_vm0, %v1258_v48 }
  0x12   : > { %v1190_v14 = vld [vmem:[%s1532_s1 + $0x20] sm:$0xff]   ;;  %v1194_v18 = vld [vmem:[%s1532_s1 + $0x18] sm:$0xff]   ;;  %v1198_v22 = vld [vmem:[%s1532_s1 + $0x10] sm:$0xff]   ;;  %232 = vst.msk [vmem:[#allocation2 + $0x28] sm:$0xff] %vm226_vm0, %v1258_v48 }
  0x13   : > { %1074 = vmatpush3.bf16.msra.mxu0 %v1182_v6  ;;  %v1191_v15 = vld [vmem:[%s1532_s1 + $0xa0] sm:$0xff]   ;;  %v1195_v19 = vld [vmem:[%s1532_s1 + $0x98] sm:$0xff]   ;;  %v1199_v23 = vld [vmem:[%s1532_s1 + $0x90] sm:$0xff]   ;;  %233 = vst.msk [vmem:[#allocation2 + $0x30] sm:$0xff] %vm226_vm0, %v1258_v48 }
  0x14   : > { %1114 = vmatpush3.bf16.msra.mxu1 %v1183_v7  ;;  %1075 = vmatprep.subr.bf16.mxu0 %v1184_v8  ;;  %v1200_v24 = vld [vmem:[%s1532_s1 + $0x48] sm:$0xff]   ;;  %v1204_v28 = vld [vmem:[%s1532_s1 + $0x40] sm:$0xff]   ;;  %234 = vst.msk [vmem:[#allocation2 + $0x38] sm:$0xff] %vm226_vm0, %v1258_v48 }
  0x15   : > { %1115 = vmatprep.subr.bf16.mxu1 %v1185_v9  ;;  %v1201_v25 = vld [vmem:[%s1532_s1 + $0xc8] sm:$0xff]   ;;  %v1205_v29 = vld [vmem:[%s1532_s1 + $0xc0] sm:$0xff]  }
  0x16   : > { %v1202_v26 = vld [vmem:[%s1532_s1 + $0x8] sm:$0xff]   ;;  %v1206_v30 = vld [vmem:[%s1532_s1] sm:$0xff]  }
  0x17   : > { %1076 = vmatpush3.bf16.msra.mxu0 %v1186_v10  ;;  %v1203_v27 = vld [vmem:[%s1532_s1 + $0x88] sm:$0xff]   ;;  %v1207_v31 = vld [vmem:[%s1532_s1 + $0x80] sm:$0xff]   ;;  %v237_v10 = vld [vmem:[#allocation2 + $0x10] sm:$0xff] }
  0x18   : > { %1116 = vmatpush3.bf16.msra.mxu1 %v1187_v11  ;;  %1077 = vmatprep.subr.bf16.mxu0 %v1188_v12  ;;  %v1208_v32 = vld [vmem:[%s1397_s6] ss:$16 sps:$4 sm:$0xff]   ;;  %v1210_v33 = vld [vmem:[%s1397_s6 + $0x4] ss:$16 sps:$4 sm:$0xff]   ;;  %v1211_v34 = vld [vmem:[%s1397_s6 + $0x8] ss:$16 sps:$4 sm:$0xff]  }
  0x19   : > { %1117 = vmatprep.subr.bf16.mxu1 %v1189_v13  ;;  %v1213_v35 = vld [vmem:[%s1397_s6 + $0xc] ss:$16 sps:$4 sm:$0xff]   ;;  %627 = vmatprep.mubr.bf16.mxu0 %v1210_v33  ;;  %v1214_v36 = vld [vmem:[%s1397_s6 + $0x24] ss:$16 sps:$4 sm:$0xff]   ;;  %v1218_v38 = vld [vmem:[%s1397_s6 + $0x20] ss:$16 sps:$4 sm:$0xff]  }
  0x1a   : > { %692 = vmatprep.mubr.bf16.mxu1 %v1213_v35  ;;  %v1216_v37 = vld [vmem:[%s1397_s6 + $0x2c] ss:$16 sps:$4 sm:$0xff]   ;;  %v1219_v39 = vld [vmem:[%s1397_s6 + $0x28] ss:$16 sps:$4 sm:$0xff]   ;;  %v1220_v40 = vld [vmem:[%s1397_s6 + $0x44] ss:$16 sps:$4 sm:$0xff]  }
  0x1b   : > { %1078 = vmatpush3.bf16.msra.mxu0 %v1190_v14  ;;  %v1222_v41 = vld [vmem:[%s1397_s6 + $0x4c] ss:$16 sps:$4 sm:$0xff]   ;;  %v1224_v42 = vld [vmem:[%s1397_s6 + $0x40] ss:$16 sps:$4 sm:$0xff]   ;;  %v1225_v43 = vld [vmem:[%s1397_s6 + $0x48] ss:$16 sps:$4 sm:$0xff]  }
  0x1c   : > { %1118 = vmatpush3.bf16.msra.mxu1 %v1191_v15  ;;  %1079 = vmatprep.subr.bf16.mxu0 %v1192_v16  ;;  %v1226_v44 = vld [vmem:[%s1397_s6 + $0x64] ss:$16 sps:$4 sm:$0xff]   ;;  %v1228_v45 = vld [vmem:[%s1397_s6 + $0x6c] ss:$16 sps:$4 sm:$0xff]   ;;  %v1230_v46 = vld [vmem:[%s1397_s6 + $0x60] ss:$16 sps:$4 sm:$0xff]  }
  0x1d   : > { %1119 = vmatprep.subr.bf16.mxu1 %v1193_v17  ;;  %v1231_v47 = vld [vmem:[%s1397_s6 + $0x68] ss:$16 sps:$4 sm:$0xff]   ;;  %v235_v56 = vld [vmem:[#allocation2] sm:$0xff] }
  0x1e   : > { %v236_v1 = vld [vmem:[#allocation2 + $0x8] sm:$0xff] }
  0x1f   : > { %1080 = vmatpush3.bf16.msra.mxu0 %v1194_v18 }
  0x20   : > { %1120 = vmatpush3.bf16.msra.mxu1 %v1195_v19  ;;  %1081 = vmatprep.subr.bf16.mxu0 %v1196_v20  ;;  %v238_v19 = vld [vmem:[#allocation2 + $0x18] sm:$0xff] }
  0x21   : > { %1121 = vmatprep.subr.bf16.mxu1 %v1197_v21 }
  0x23   : > { %1082 = vmatpush3.bf16.msra.mxu0 %v1198_v22 }
  0x24   : > { %1122 = vmatpush3.bf16.msra.mxu1 %v1199_v23  ;;  %1083 = vmatprep.subr.bf16.mxu0 %v1200_v24 }
  0x25   : > { %1123 = vmatprep.subr.bf16.mxu1 %v1201_v25 }
  0x27   : > { %1084 = vmatpush3.bf16.msra.mxu0 %v1202_v26 }
  0x28   : > { %1124 = vmatpush3.bf16.msra.mxu1 %v1203_v27  ;;  %1085 = vmatprep.subr.bf16.mxu0 %v1204_v28  ;;  %v239_v28 = vld [vmem:[#allocation2 + $0x20] sm:$0xff] }
  0x29   : > { %1125 = vmatprep.subr.bf16.mxu1 %v1205_v29 }
  0x2b   : > { %1086 = vmatpush3.bf16.msra.mxu0 %v1206_v30 }
  0x2c   : > { %1126 = vmatpush3.bf16.msra.mxu1 %v1207_v31 }
  0x2e   : > { %628 = vmatmul.mubr.bf16.vlgmr.msra.gmra.mxu0 %v1208_v32 }
  0x2f   : > { %693 = vmatmul.mubr.bf16.vlgmr.msra.gmra.mxu1 %v1211_v34  ;;  %635 = vmatprep.mubr.bf16.mxu0 %v1214_v36 }
  0x30   : > { %700 = vmatprep.mubr.bf16.mxu1 %v1216_v37 }
  0x36   : > { %636 = vmatmul.mubr.bf16.gmra.mxu0 %v1218_v38  ;;  %v240_v38 = vld [vmem:[#allocation2 + $0x28] sm:$0xff] }
  0x37   : > { %701 = vmatmul.mubr.bf16.gmra.mxu1 %v1219_v39  ;;  %643 = vmatprep.mubr.bf16.mxu0 %v1220_v40 }
  0x38   : > { %708 = vmatprep.mubr.bf16.mxu1 %v1222_v41  ;;  %v1436_v41 = vld [vmem:[%s1533_s2] ss:$0 sm:$0xff] }
  0x3e   : > { %644 = vmatmul.mubr.bf16.gmra.mxu0 %v1224_v42 }
  0x3f   : > { %709 = vmatmul.mubr.bf16.gmra.mxu1 %v1225_v43  ;;  %651 = vmatprep.mubr.bf16.mxu0 %v1226_v44 }
  0x40   : > { %716 = vmatprep.mubr.bf16.mxu1 %v1228_v45 }
  0x46   : > { %652 = vmatmul.mubr.bf16.gmra.mxu0 %v1230_v46 }
  0x47   : > { %717 = vmatmul.mubr.bf16.gmra.mxu1 %v1231_v47 }
  0xee   : > { %v1087_v49 = vpop.f32.mrf.mxu0 }
  0xef   : > { %v1127_v50 = vpop.f32.mrf.mxu1 }
  0xf0   : > { %v1088_v51 = vpop.f32.mrf.mxu0 }
  0xf1   : > { %v1089_v52 = vadd.f32 %v1088_v51, %v1087_v49  ;;  %v1128_v53 = vpop.f32.mrf.mxu1 }
  0xf2   : > { %v1129_v54 = vadd.f32 %v1128_v53, %v1127_v50  ;;  %v1090_v55 = vpop.f32.mrf.mxu0  ;;  %v241_v53 = vld [vmem:[#allocation2 + $0x30] sm:$0xff] }
  0xf3   : > { %v1130_v57 = vpop.f32.mrf.mxu1 }
  0xf4   : > { %v695_v58 = vadd.f32 %v1129_v54, %v1089_v52  ;;  %v1091_v59 = vpop.f32.mrf.mxu0 }
  0xf5   : > { %v1092_v60 = vadd.f32 %v1091_v59, %v1090_v55  ;;  %v1131_v61 = vpop.f32.mrf.mxu1 }
  0xf6   : > { %v725_v62 = vadd.f32 %v695_v58, %v235_v56  ;;  %v1132_v63 = vadd.f32 %v1131_v61, %v1130_v57  ;;  %v1093_v0 = vpop.f32.mrf.mxu0 }
  0xf7   : > { %v1133_v2 = vpop.f32.mrf.mxu1 }
  0xf8   : > { %734 = vst.msk [vmem:[#allocation2] sm:$0xff] %vm226_vm0, %v725_v62  ;;  %v698_v3 = vadd.f32 %v1132_v63, %v1092_v60  ;;  %v1094_v4 = vpop.f32.mrf.mxu0 }
  0xf9   : > { %v1095_v5 = vadd.f32 %v1094_v4, %v1093_v0  ;;  %v1134_v6 = vpop.f32.mrf.mxu1 }
  0xfa   : > { %v726_v7 = vadd.f32 %v698_v3, %v236_v1  ;;  %v1135_v8 = vadd.f32 %v1134_v6, %v1133_v2  ;;  %v1096_v9 = vpop.f32.mrf.mxu0  ;;  %v242_v2 = vld [vmem:[#allocation2 + $0x38] sm:$0xff] }
  0xfb   : > { %v1136_v11 = vpop.f32.mrf.mxu1 }
  0xfc   : > { %735 = vst.msk [vmem:[#allocation2 + $0x8] sm:$0xff] %vm226_vm0, %v726_v7  ;;  %v703_v12 = vadd.f32 %v1135_v8, %v1095_v5  ;;  %v1097_v13 = vpop.f32.mrf.mxu0 }
  0xfd   : > { %v1098_v14 = vadd.f32 %v1097_v13, %v1096_v9  ;;  %v1137_v15 = vpop.f32.mrf.mxu1 }
  0xfe   : > { %v727_v16 = vadd.f32 %v703_v12, %v237_v10  ;;  %v1138_v17 = vadd.f32 %v1137_v15, %v1136_v11  ;;  %v1099_v18 = vpop.f32.mrf.mxu0 }
  0xff   : > { %v1139_v20 = vpop.f32.mrf.mxu1  ;;  %v745_v40 = vld [vmem:[#allocation2] sm:$0xff] }
 0x100   : > { %736 = vst.msk [vmem:[#allocation2 + $0x10] sm:$0xff] %vm226_vm0, %v727_v16  ;;  %v706_v21 = vadd.f32 %v1138_v17, %v1098_v14  ;;  %v1100_v22 = vpop.f32.mrf.mxu0  ;;  %v1443_v51 = vadd.f32 %v1436_v41, %v745_v40 }
 0x101   : > { %v1101_v23 = vadd.f32 %v1100_v22, %v1099_v18  ;;  %v1140_v24 = vpop.f32.mrf.mxu1 }
 0x102   : > { %v728_v25 = vadd.f32 %v706_v21, %v238_v19  ;;  %v1141_v26 = vadd.f32 %v1140_v24, %v1139_v20  ;;  %v1102_v27 = vpop.f32.mrf.mxu0  ;;  %v791_v0 = vmul.f32 %v1443_v51, %v1443_v51  ;;  %v768_v7 = vsel %vm226_vm0, %v1443_v51, 0.0 }
 0x103   : > { %v1142_v29 = vpop.f32.mrf.mxu1  ;;  %v746_v37 = vld [vmem:[#allocation2 + $0x8] sm:$0xff] }
 0x104   : > { %737 = vst.msk [vmem:[#allocation2 + $0x18] sm:$0xff] %vm226_vm0, %v728_v25  ;;  %v711_v30 = vadd.f32 %v1141_v26, %v1101_v23  ;;  %v1103_v31 = vpop.f32.mrf.mxu0  ;;  %v1440_v47 = vadd.f32 %v1436_v41, %v746_v37  ;;  %v799_v12 = vsel %vm226_vm0, %v791_v0, 0.0 }
 0x105   : > { %v1104_v32 = vadd.f32 %v1103_v31, %v1102_v27  ;;  %v1143_v33 = vpop.f32.mrf.mxu1 }
 0x106   : > { %v729_v34 = vadd.f32 %v711_v30, %v239_v28  ;;  %v1144_v35 = vadd.f32 %v1143_v33, %v1142_v29  ;;  %v1105_v36 = vpop.f32.mrf.mxu0  ;;  %v792_v60 = vmul.f32 %v1440_v47, %v1440_v47  ;;  %v769_v3 = vsel %vm226_vm0, %v1440_v47, 0.0 }
 0x107   : > { %v1145_v39 = vpop.f32.mrf.mxu1  ;;  %v747_v44 = vld [vmem:[#allocation2 + $0x10] sm:$0xff]  ;;  %v770_v13 = vadd.f32 %v769_v3, %v768_v7 }
 0x108   : > { %738 = vst.msk [vmem:[#allocation2 + $0x20] sm:$0xff] %vm226_vm0, %v729_v34  ;;  %v714_v42 = vadd.f32 %v1144_v35, %v1104_v32  ;;  %v1106_v43 = vpop.f32.mrf.mxu0  ;;  %v1446_v55 = vadd.f32 %v1436_v41, %v747_v44  ;;  %v800_v8 = vsel %vm226_vm0, %v792_v60, 0.0 }
 0x109   : > { %v1107_v45 = vadd.f32 %v1106_v43, %v1105_v36  ;;  %v1146_v46 = vpop.f32.mrf.mxu1  ;;  %v801_v19 = vadd.f32 %v800_v8, %v799_v12 }
 0x10a   : > { %v730_v48 = vadd.f32 %v714_v42, %v240_v38  ;;  %v1147_v49 = vadd.f32 %v1146_v46, %v1145_v39  ;;  %v1108_v50 = vpop.f32.mrf.mxu0  ;;  %v793_v4 = vmul.f32 %v1446_v55, %v1446_v55  ;;  %v771_v9 = vsel %vm226_vm0, %v1446_v55, 0.0 }
 0x10b   : > { %v748_v52 = vld [vmem:[#allocation2 + $0x18] sm:$0xff]  ;;  %v1148_v54 = vpop.f32.mrf.mxu1  ;;  %v772_v20 = vadd.f32 %v771_v9, %v770_v13 }
 0x10c   : > { %739 = vst.msk [vmem:[#allocation2 + $0x28] sm:$0xff] %vm226_vm0, %v730_v48  ;;  %v719_v56 = vadd.f32 %v1147_v49, %v1107_v45  ;;  %v1109_v57 = vpop.f32.mrf.mxu0  ;;  %v1452_v61 = vadd.f32 %v1436_v41, %v748_v52  ;;  %v802_v15 = vsel %vm226_vm0, %v793_v4, 0.0 }
 0x10d   : > { %v1110_v58 = vadd.f32 %v1109_v57, %v1108_v50  ;;  %v1149_v59 = vpop.f32.mrf.mxu1  ;;  %v803_v24 = vadd.f32 %v802_v15, %v801_v19 }
 0x10e   : > { %v731_v62 = vadd.f32 %v719_v56, %v241_v53  ;;  %v1150_v63 = vadd.f32 %v1149_v59, %v1148_v54  ;;  %v794_v10 = vmul.f32 %v1452_v61, %v1452_v61  ;;  %v773_v16 = vsel %vm226_vm0, %v1452_v61, 0.0 }
 0x10f   : > { %v749_v1 = vld [vmem:[#allocation2 + $0x20] sm:$0xff]  ;;  %v774_v25 = vadd.f32 %v773_v16, %v772_v20 }
 0x110   : > { %v1461_v5 = vadd.f32 %v1436_v41, %v749_v1  ;;  %740 = vst.msk [vmem:[#allocation2 + $0x30] sm:$0xff] %vm226_vm0, %v731_v62  ;;  %v722_v6 = vadd.f32 %v1150_v63, %v1110_v58  ;;  %v804_v21 = vsel %vm226_vm0, %v794_v10, 0.0 }
 0x111   : > { %v805_v30 = vadd.f32 %v804_v21, %v803_v24 }
 0x112   : > { %v732_v11 = vadd.f32 %v722_v6, %v242_v2  ;;  %v795_v17 = vmul.f32 %v1461_v5, %v1461_v5  ;;  %v775_v22 = vsel %vm226_vm0, %v1461_v5, 0.0 }
 0x113   : > { %v750_v14 = vld [vmem:[#allocation2 + $0x28] sm:$0xff]  ;;  %v776_v31 = vadd.f32 %v775_v22, %v774_v25 }
 0x114   : > { %v1478_v18 = vadd.f32 %v1436_v41, %v750_v14  ;;  %741 = vst.msk [vmem:[#allocation2 + $0x38] sm:$0xff] %vm226_vm0, %v732_v11  ;;  %v806_v27 = vsel %vm226_vm0, %v795_v17, 0.0 }
 0x115   : > { %v807_v35 = vadd.f32 %v806_v27, %v805_v30 }
 0x116   : > { %v796_v23 = vmul.f32 %v1478_v18, %v1478_v18  ;;  %v777_v28 = vsel %vm226_vm0, %v1478_v18, 0.0 }
 0x117   : > { %v751_v26 = vld [vmem:[#allocation2 + $0x30] sm:$0xff]  ;;  %v778_v36 = vadd.f32 %v777_v28, %v776_v31 }
 0x118   : > { %v766_v29 = vadd.f32 %v1436_v41, %v751_v26  ;;  %v808_v32 = vsel %vm226_vm0, %v796_v23, 0.0 }
 0x119   : > { %v809_v40 = vadd.f32 %v808_v32, %v807_v35 }
 0x11a   : > { %v779_v33 = vsel %vm226_vm0, %v766_v29, 0.0  ;;  %v797_v34 = vmul.f32 %v766_v29, %v766_v29 }
 0x11b   : > { %v752_v37 = vld [vmem:[#allocation2 + $0x38] sm:$0xff]  ;;  %v780_v42 = vadd.f32 %v779_v33, %v778_v36 }
 0x11c   : > { %v810_v38 = vsel %vm226_vm0, %v797_v34, 0.0  ;;  %v767_v39 = vadd.f32 %v1436_v41, %v752_v37 }
 0x11d   : > { %v811_v45 = vadd.f32 %v810_v38, %v809_v40 }
 0x11e   : > { %v781_v43 = vsel %vm226_vm0, %v767_v39, 0.0  ;;  %v798_v44 = vmul.f32 %v767_v39, %v767_v39 }
 0x11f   : > { %v782_v46 = vadd.f32 %v781_v43, %v780_v42 }
 0x120   : > { %v812_v48 = vsel %vm226_vm0, %v798_v44, 0.0 }
 0x121   : > { %v783_v49 = vrot.slane %v782_v46, 4  ;;  %v813_v50 = vadd.f32 %v812_v48, %v811_v45 }
 0x123   : > { %v784_v52 = vadd.f32 %v783_v49, %v782_v46  ;;  %v814_v53 = vrot.slane %v813_v50, 4 }
 0x125   : > { %v785_v54 = vrot.slane %v784_v52, 2  ;;  %v815_v56 = vadd.f32 %v814_v53, %v813_v50 }
 0x127   : > { %v786_v57 = vadd.f32 %v785_v54, %v784_v52  ;;  %v816_v58 = vrot.slane %v815_v56, 2 }
 0x129   : > { %v787_v59 = vrot.slane %v786_v57, 1  ;;  %v817_v60 = vadd.f32 %v816_v58, %v815_v56 }
 0x12b   : > { %v788_v41 = vadd.f32 %v787_v59, %v786_v57  ;;  %v818_v62 = vrot.slane %v817_v60, 1 }
 0x12d   : > { %v790_v63 = vmul.f32 0.015625, %v788_v41  ;;  %v819_v0 = vadd.f32 %v818_v62, %v817_v60 }
 0x12f   : > { %v820_v1 = vmul.f32 0.015625, %v819_v0  ;;  %v821_v2 = vmul.f32 %v790_v63, %v790_v63  ;;  %v824_v7 = vsub.f32 %v1443_v51, %v790_v63  ;;  %v825_v8 = vsub.f32 %v1440_v47, %v790_v63 }
 0x130   : > { %v826_v9 = vsub.f32 %v1446_v55, %v790_v63  ;;  %v827_v10 = vsub.f32 %v1452_v61, %v790_v63  ;;  %v828_v12 = vsub.f32 %v1461_v5, %v790_v63  ;;  %v829_v13 = vsub.f32 %v1478_v18, %v790_v63 }
 0x131   : > { %v822_v3 = vsub.f32 %v820_v1, %v821_v2  ;;  %v830_v14 = vsub.f32 %v766_v29, %v790_v63  ;;  %v831_v15 = vsub.f32 %v767_v39, %v790_v63 }
 0x133   : > { %v823_v4 = vmax.f32 %v822_v3, 0.0 }
 0x135   : > { %v832_v6 = vadd.f32 1e-05, %v823_v4 }
 0x137   : > { %1232 = vrsqrt.f32 %v832_v6 }
 0x144   : > { %v1233_v11 = vpop.eup %1232 }
 0x145   : > { %v834_v16 = vmul.f32 %v1233_v11, %v824_v7  ;;  %v835_v17 = vmul.f32 %v1233_v11, %v825_v8  ;;  %v836_v19 = vmul.f32 %v1233_v11, %v826_v9  ;;  %v837_v20 = vmul.f32 %v1233_v11, %v827_v10 }
 0x146   : > { %v838_v51 = vmul.f32 %v1233_v11, %v828_v12  ;;  %v839_v21 = vmul.f32 %v1233_v11, %v829_v13  ;;  %v840_v47 = vmul.f32 %v1233_v11, %v830_v14  ;;  %v841_v22 = vmul.f32 %v1233_v11, %v831_v15 }
 0x147   : > { %vm842_vm2 = vcmp.gt.f32.partialorder %v834_v16, 0.0  ;;  %vm843_vm3 = vcmp.gt.f32.partialorder %v835_v17, 0.0  ;;  %vm844_vm4 = vcmp.gt.f32.partialorder %v836_v19, 0.0  ;;  %vm845_vm5 = vcmp.gt.f32.partialorder %v837_v20, 0.0 }
 0x148   : > { %vm846_vm6 = vcmp.gt.f32.partialorder %v838_v51, 0.0  ;;  %vm847_vm7 = vcmp.gt.f32.partialorder %v839_v21, 0.0  ;;  %vm848_vm8 = vcmp.gt.f32.partialorder %v840_v47, 0.0  ;;  %vm849_vm9 = vcmp.gt.f32.partialorder %v841_v22, 0.0 }
 0x149   : > { %v850_v55 = vmul.f32 0.2, %v834_v16  ;;  %v851_v61 = vmul.f32 0.2, %v835_v17  ;;  %v852_v5 = vmul.f32 0.2, %v836_v19 }
 0x14a   : > { %v853_v18 = vmul.f32 0.2, %v837_v20  ;;  %v854_v23 = vmul.f32 0.2, %v838_v51  ;;  %v855_v24 = vmul.f32 0.2, %v839_v21 }
 0x14b   : > { %v856_v25 = vmul.f32 0.2, %v840_v47  ;;  %v857_v26 = vmul.f32 0.2, %v841_v22  ;;  %v858_v27 = vsel %vm842_vm2, %v834_v16, %v850_v55  ;;  %v859_v28 = vsel %vm843_vm3, %v835_v17, %v851_v61 }
 0x14c   : > { %v860_v29 = vsel %vm844_vm4, %v836_v19, %v852_v5  ;;  %v861_v30 = vsel %vm845_vm5, %v837_v20, %v853_v18  ;;  %v862_v31 = vsel %vm846_vm6, %v838_v51, %v854_v23  ;;  %v863_v32 = vsel %vm847_vm7, %v839_v21, %v855_v24 }
 0x14d   : > { %v864_v33 = vsel %vm848_vm8, %v840_v47, %v856_v25  ;;  %v865_v34 = vsel %vm849_vm9, %v841_v22, %v857_v26  ;;  %v1063_v35 = vpack.c.bf16 %v858_v27, %v858_v27  ;;  %v1064_v36 = vpack.c.bf16 %v859_v28, %v859_v28 }
 0x14e   : > { %v1065_v37 = vpack.c.bf16 %v860_v29, %v860_v29  ;;  %v1066_v38 = vpack.c.bf16 %v861_v30, %v861_v30  ;;  %v1067_v39 = vpack.c.bf16 %v862_v31, %v862_v31  ;;  %v1068_v40 = vpack.c.bf16 %v863_v32, %v863_v32 }
 0x14f   : > { %v1069_v42 = vpack.c.bf16 %v864_v33, %v864_v33  ;;  %v1070_v43 = vpack.c.bf16 %v865_v34, %v865_v34  ;;  %899 = vst.msk [vmem:[%s220_s12] sm:$0xf] %vm898_vm1, %v1063_v35  ;;  %900 = vst.msk [vmem:[%s220_s12 + $0x4] sm:$0xf] %vm898_vm1, %v1064_v36 }
 0x150   : > { %901 = vst.msk [vmem:[%s220_s12 + $0x8] sm:$0xf] %vm898_vm1, %v1065_v37  ;;  %902 = vst.msk [vmem:[%s220_s12 + $0xc] sm:$0xf] %vm898_vm1, %v1066_v38 }
 0x151   : > { %903 = vst.msk [vmem:[%s220_s12 + $0x10] sm:$0xf] %vm898_vm1, %v1067_v39  ;;  %904 = vst.msk [vmem:[%s220_s12 + $0x14] sm:$0xf] %vm898_vm1, %v1068_v40 }
 0x152   : > { %905 = vst.msk [vmem:[%s220_s12 + $0x18] sm:$0xf] %vm898_vm1, %v1069_v42  ;;  %906 = vst.msk [vmem:[%s220_s12 + $0x1c] sm:$0xf] %vm898_vm1, %v1070_v43 }
 0x153 PF: > { %s13_s14 = sadd.s32 1, %s1256_s14   ;;  %s1535_s12 = smov %s1252_s13 }
 0x154   : > { %p10_p5 = scmp.ge.s32.totalorder %s13_s14, 4   ;;  %s1536_s13 = smov %s1538_s15 }
 0x156   :  { %12 = sbr.rel (!%p10_p5) target bundleno = 2 (0x2), region = 73 }

// kernel: discriminator_forward.7
= control target key start
LH: loop header
LB: loop body
LE: loop exit
PB: predicated region body
PF: predicated region fallthrough
CT: control target
= control target key end

     0   :  { %s1040_s12 = smov 0   ;;  %s1042_s13 = smov 0   ;;  %s1181_s0 = inlined_call_operand.vmem [shape: bf16[2,16,1024], index: 0, kind: input, shape index: {}]   ;;  %s1182_s1 = inlined_call_operand.vmem [shape: bf16[1024,128], index: 1, kind: input, shape index: {}]   ;;  %s1183_s2 = inlined_call_operand.vmem [shape: f32[1,128], index: 2, kind: input, shape index: {}]   ;;  %s1184_s3 = inlined_call_operand.vmem [shape: bf16[2,16,128], index: 3, kind: output, shape index: {}]  }
   0x1   :  { %s1044_s14 = smov 0   ;;  %s1046_s15 = smov 0  }
   0x2   :  { %s1048_s16 = smov 0   ;;  %s1050_s17 = smov 0  }
   0x3   :  { %s1052_s18 = smov 0  }
   0x4 LB: > { %s22_s19 = sadd.s32 1, %s1009_s16  ;;  %s25_s20 = sadd.s32 1, %s1013_s17  ;;  %s1017_s18 = sphi %s1052_s18, %s13_s18   ;;  %s1013_s17 = sphi %s1050_s17, %s1190_s17   ;;  %s1009_s16 = sphi %s1048_s16, %s1189_s16   ;;  %s1005_s15 = sphi %s1046_s15, %s1188_s15   ;;  %s1001_s14 = sphi %s1044_s14, %s1187_s14   ;;  %s997_s13 = sphi %s1042_s13, %s1186_s13   ;;  %s993_s12 = sphi %s1040_s12, %s1185_s12  }
   0x5   : > { %p23_p0 = scmp.ge.s32.totalorder %s22_s19, 2  ;;  %p41_p1 = scmp.ne.s32.totalorder %s997_s13, %s993_s12 }
   0x6   : > { %p42_p2 = scmp.eq.s32.totalorder %s1017_s18, 0  ;;  %s34_s24 = sadd.s32 1, %s997_s13 }
   0x7   : > { %s1192_s19 = smov (%p23_p0, %s22_s19), 0  ;;  %s1194_s20 = smov (!%p23_p0, %s25_s20), %s1013_s17 }
   0x8   : > { %p43_p3 = por %p42_p2, %p41_p1  ;;  %p27_p4 = scmp.ge.s32.totalorder %s1194_s20, 2 }
   0x9   : > { %s30_s21 = ssub.s32 %s1009_s16, %s1192_s19  ;;  %p760_p6 = scmp.ge.s32.totalorder %s1017_s18, 4 }
   0xa   : > { %s1196_s20 = smov (%p27_p4, %s1194_s20), 0 }
   0xb   : > { %s29_s22 = ssub.s32 %s1013_s17, %s1196_s20  ;;  %143 = sbr.rel (%p760_p6) target bundleno = 25 (0x19), region = 20 }
   0xc   : > { %s31_s23 = sor.u32 %s30_s21, %s29_s22 }
   0xd   : > { %p32_p5 = scmp.eq.s32.totalorder %s31_s23, 0 }
   0xf   : > { %s1091_s25 = scalar_select %p32_p5, %s997_s13, %s34_s24  }
  0x10   : > { %146 = sbr.rel (!%p43_p3) target bundleno = 25 (0x19), region = 24  ;;  %s148_s26 = sand.u32 (%p43_p3), 1, %s997_s13  }
  0x11   : > { %s762_s27 = sshll.u32 (%p43_p3), %s1009_s16, 2  ;;  %s761_s28 = sshll.u32 (%p43_p3), %s148_s26, 5 }
  0x12   : > { %s763_s29 = sshll.u32 (%p43_p3), %s1013_s17, 4  ;;  %s150_s8 = scalar_lea.vmem (%p43_p3), [#allocation3], %s761_s28 }
  0x13   : > { %s153_s30 = sadd.s32 (%p43_p3), %s763_s29, %s762_s27 }
  0x14   : > { %s764_s4 = sshll.u32 (%p43_p3), %s153_s30, 2 }
  0x15   : > { %s155_s7 = scalar_lea.vmem %s1181_s0, %s764_s4 }
  0x16   : > { %v168_v0 = vld [vmem:[%s155_s7] sm:$0xff]  ;;  %v170_v1 = vld [vmem:[%s155_s7 + $0x8] sm:$0xff] }
  0x17   : > { %v172_v2 = vld [vmem:[%s155_s7 + $0x20] sm:$0xff]  ;;  %169 = vst [vmem:[%s150_s8] sm:$0xff] %v168_v0  ;;  %171 = vst [vmem:[%s150_s8 + $0x8] sm:$0xff] %v170_v1  ;;  %v174_v3 = vld [vmem:[%s155_s7 + $0x28] sm:$0xff] }
  0x18   : > { %173 = vst [vmem:[%s150_s8 + $0x10] sm:$0xff] %v172_v2  ;;  %175 = vst [vmem:[%s150_s8 + $0x18] sm:$0xff] %v174_v3 }
  0x19 PF: > { %p765_p7 = scmp.ge.s32.totalorder %s1017_s18, 1  ;;  %p189_p8 = scmp.lt.s32.totalorder %s1017_s18, 5 }
  0x1b   : > { %p190_p9 = pnand %p765_p7, %p189_p8 }
  0x1c   : > { %s196_s9 = sand.u32 (!%p190_p9), 1, %s993_s12   ;;  %s767_s10 = sshll.u32 (!%p190_p9), %s1001_s14, 6 }
  0x1d   : > { %193 = sbr.rel (%p190_p9) target bundleno = 340 (0x154), region = 51  ;;  %s766_s11 = sshll.u32 (!%p190_p9), %s196_s9, 5 }
  0x1e   : > { %p226_p10 = scmp.lt.s32.totalorder (!%p190_p9), %s767_s10, 127  ;;  %p231_p11 = scmp.lt.s32.totalorder (!%p190_p9), %s1005_s15, 1 }
  0x1f   : > { %s1116_s30 = scalar_lea.vmem (!%p190_p9), [#allocation3], %s766_s11  ;;  %p771_p12 = scmp.ne.s32.totalorder (!%p190_p9), %s1001_s14, 0 }
  0x22   : > { %s1198_s10 = smov (!%p226_p10, %s767_s10), 127  ;;  %s1200_s15 = smov (!%p231_p11, %s1005_s15), 1 }
  0x23   : > { %s768_s21 = sshll.u32 %s1198_s10, 2  ;;  %s814_s26 = sshll.u32 %s1200_s15, 3 }
  0x24   : > { %s1109_s24 = scalar_lea.vmem %s1182_s1, %s768_s21  ;;  %s1114_s29 = scalar_lea.vmem %s1184_s3, %s814_s26 }
  0x25   : > { %240 = sbr.rel (%p771_p12) target bundleno = 44 (0x2c), region = 59 }
  0x2a   : > { %v1019_v4 = vmov 0.0  }
  0x2b   : > { %241 = vst [vmem:[#allocation2] sm:$0xff] %v1019_v4  ;;  %242 = vst [vmem:[#allocation2 + $0x8] sm:$0xff] %v1019_v4 }
  0x2c PF: > { %v923_v5 = vld [vmem:[%s1109_s24 + $0x78] sm:$0xff]   ;;  %v927_v9 = vld [vmem:[%s1109_s24 + $0x70] sm:$0xff]   ;;  %v931_v13 = vld [vmem:[%s1109_s24 + $0x68] sm:$0xff]   ;;  %p808_p13 = scmp.ne.s32.totalorder %s1001_s14, 1 }
  0x2d   : > { %v924_v6 = vld [vmem:[%s1109_s24 + $0xf8] sm:$0xff]   ;;  %822 = vmatprep.subr.bf16.mxu0 %v923_v5  ;;  %v928_v10 = vld [vmem:[%s1109_s24 + $0xf0] sm:$0xff]   ;;  %v932_v14 = vld [vmem:[%s1109_s24 + $0xe8] sm:$0xff]  }
  0x2e   : > { %v925_v7 = vld [vmem:[%s1109_s24 + $0x38] sm:$0xff]   ;;  %844 = vmatprep.subr.bf16.mxu1 %v924_v6  ;;  %v929_v11 = vld [vmem:[%s1109_s24 + $0x30] sm:$0xff]   ;;  %v933_v15 = vld [vmem:[%s1109_s24 + $0x28] sm:$0xff]  }
  0x2f   : > { %v926_v8 = vld [vmem:[%s1109_s24 + $0xb8] sm:$0xff]   ;;  %823 = vmatpush3.bf16.msra.mxu0 %v925_v7  ;;  %v930_v12 = vld [vmem:[%s1109_s24 + $0xb0] sm:$0xff]   ;;  %v934_v16 = vld [vmem:[%s1109_s24 + $0xa8] sm:$0xff]  }
  0x30   : > { %845 = vmatpush3.bf16.msra.mxu1 %v926_v8  ;;  %824 = vmatprep.subr.bf16.mxu0 %v927_v9  ;;  %v935_v17 = vld [vmem:[%s1109_s24 + $0x60] sm:$0xff]   ;;  %v939_v21 = vld [vmem:[%s1109_s24 + $0x58] sm:$0xff]   ;;  %v943_v25 = vld [vmem:[%s1109_s24 + $0x50] sm:$0xff]  }
  0x31   : > { %846 = vmatprep.subr.bf16.mxu1 %v928_v10  ;;  %v936_v18 = vld [vmem:[%s1109_s24 + $0xe0] sm:$0xff]   ;;  %v940_v22 = vld [vmem:[%s1109_s24 + $0xd8] sm:$0xff]   ;;  %v944_v26 = vld [vmem:[%s1109_s24 + $0xd0] sm:$0xff]  }
  0x32   : > { %v937_v19 = vld [vmem:[%s1109_s24 + $0x20] sm:$0xff]   ;;  %v941_v23 = vld [vmem:[%s1109_s24 + $0x18] sm:$0xff]   ;;  %v945_v27 = vld [vmem:[%s1109_s24 + $0x10] sm:$0xff]  }
  0x33   : > { %825 = vmatpush3.bf16.msra.mxu0 %v929_v11  ;;  %v938_v20 = vld [vmem:[%s1109_s24 + $0xa0] sm:$0xff]   ;;  %v942_v24 = vld [vmem:[%s1109_s24 + $0x98] sm:$0xff]   ;;  %v946_v28 = vld [vmem:[%s1109_s24 + $0x90] sm:$0xff]  }
  0x34   : > { %847 = vmatpush3.bf16.msra.mxu1 %v930_v12  ;;  %826 = vmatprep.subr.bf16.mxu0 %v931_v13  ;;  %v947_v29 = vld [vmem:[%s1109_s24 + $0x48] sm:$0xff]   ;;  %v951_v33 = vld [vmem:[%s1109_s24 + $0x40] sm:$0xff]  }
  0x35   : > { %848 = vmatprep.subr.bf16.mxu1 %v932_v14  ;;  %v948_v30 = vld [vmem:[%s1109_s24 + $0xc8] sm:$0xff]   ;;  %v952_v34 = vld [vmem:[%s1109_s24 + $0xc0] sm:$0xff]  }
  0x36   : > { %v949_v31 = vld [vmem:[%s1109_s24 + $0x8] sm:$0xff]   ;;  %v953_v35 = vld [vmem:[%s1109_s24] sm:$0xff]  }
  0x37   : > { %827 = vmatpush3.bf16.msra.mxu0 %v933_v15  ;;  %v950_v32 = vld [vmem:[%s1109_s24 + $0x88] sm:$0xff]   ;;  %v954_v36 = vld [vmem:[%s1109_s24 + $0x80] sm:$0xff]  }
  0x38   : > { %849 = vmatpush3.bf16.msra.mxu1 %v934_v16  ;;  %828 = vmatprep.subr.bf16.mxu0 %v935_v17  ;;  %v955_v37 = vld [vmem:[%s1116_s30] ss:$16 sps:$4 sm:$0xff]   ;;  %v957_v38 = vld [vmem:[%s1116_s30 + $0x4] ss:$16 sps:$4 sm:$0xff]   ;;  %v958_v39 = vld [vmem:[%s1116_s30 + $0x8] ss:$16 sps:$4 sm:$0xff]  }
  0x39   : > { %850 = vmatprep.subr.bf16.mxu1 %v936_v18  ;;  %v960_v40 = vld [vmem:[%s1116_s30 + $0xc] ss:$16 sps:$4 sm:$0xff]   ;;  %557 = vmatprep.mubr.bf16.mxu0 %v957_v38  ;;  %v243_v48 = vld [vmem:[#allocation2] sm:$0xff] }
  0x3a   : > { %598 = vmatprep.mubr.bf16.mxu1 %v960_v40  ;;  %v244_v56 = vld [vmem:[#allocation2 + $0x8] sm:$0xff] }
  0x3b   : > { %829 = vmatpush3.bf16.msra.mxu0 %v937_v19 }
  0x3c   : > { %851 = vmatpush3.bf16.msra.mxu1 %v938_v20  ;;  %830 = vmatprep.subr.bf16.mxu0 %v939_v21 }
  0x3d   : > { %852 = vmatprep.subr.bf16.mxu1 %v940_v22 }
  0x3f   : > { %831 = vmatpush3.bf16.msra.mxu0 %v941_v23 }
  0x40   : > { %853 = vmatpush3.bf16.msra.mxu1 %v942_v24  ;;  %832 = vmatprep.subr.bf16.mxu0 %v943_v25 }
  0x41   : > { %854 = vmatprep.subr.bf16.mxu1 %v944_v26 }
  0x43   : > { %833 = vmatpush3.bf16.msra.mxu0 %v945_v27 }
  0x44   : > { %855 = vmatpush3.bf16.msra.mxu1 %v946_v28  ;;  %834 = vmatprep.subr.bf16.mxu0 %v947_v29 }
  0x45   : > { %856 = vmatprep.subr.bf16.mxu1 %v948_v30 }
  0x47   : > { %835 = vmatpush3.bf16.msra.mxu0 %v949_v31 }
  0x48   : > { %857 = vmatpush3.bf16.msra.mxu1 %v950_v32  ;;  %836 = vmatprep.subr.bf16.mxu0 %v951_v33 }
  0x49   : > { %858 = vmatprep.subr.bf16.mxu1 %v952_v34 }
  0x4b   : > { %837 = vmatpush3.bf16.msra.mxu0 %v953_v35 }
  0x4c   : > { %859 = vmatpush3.bf16.msra.mxu1 %v954_v36 }
  0x4e   : > { %558 = vmatmul.mubr.bf16.vlgmr.msra.gmra.mxu0 %v955_v37 }
  0x4f   : > { %599 = vmatmul.mubr.bf16.vlgmr.msra.gmra.mxu1 %v958_v39 }
 0x10e   : > { %v838_v41 = vpop.f32.mrf.mxu0 }
 0x10f   : > { %v860_v42 = vpop.f32.mrf.mxu1 }
 0x110   : > { %v839_v43 = vpop.f32.mrf.mxu0 }
 0x111   : > { %v840_v44 = vadd.f32 %v839_v43, %v838_v41  ;;  %v861_v45 = vpop.f32.mrf.mxu1 }
 0x112   : > { %v862_v46 = vadd.f32 %v861_v45, %v860_v42  ;;  %v841_v47 = vpop.f32.mrf.mxu0 }
 0x113   : > { %v863_v49 = vpop.f32.mrf.mxu1 }
 0x114   : > { %v601_v50 = vadd.f32 %v862_v46, %v840_v44  ;;  %v842_v51 = vpop.f32.mrf.mxu0 }
 0x115   : > { %v843_v52 = vadd.f32 %v842_v51, %v841_v47  ;;  %v864_v53 = vpop.f32.mrf.mxu1 }
 0x116   : > { %v607_v54 = vadd.f32 %v601_v50, %v243_v48  ;;  %v865_v55 = vadd.f32 %v864_v53, %v863_v49 }
 0x118   : > { %609 = vst [vmem:[#allocation2] sm:$0xff] %v607_v54  ;;  %v604_v57 = vadd.f32 %v865_v55, %v843_v52  ;;  %614 = sbr.rel (%p808_p13) target bundleno = 340 (0x154), region = 63 }
 0x11a   : > { %v608_v58 = vadd.f32 %v604_v57, %v244_v56 }
 0x11c   : > { %610 = vst [vmem:[#allocation2 + $0x8] sm:$0xff] %v608_v58 }
 0x11d   : > { %v809_v61 = vld [vmem:[%s1183_s2] ss:$0 sm:$0xff] }
 0x11f   : > { %v615_v59 = vld [vmem:[#allocation2] sm:$0xff] }
 0x120   : > { %v624_v62 = vadd.f32 %v809_v61, %v615_v59 }
 0x122   : > { %v635_v1 = vmul.f32 %v624_v62, %v624_v62 }
 0x123   : > { %v616_v60 = vld [vmem:[#allocation2 + $0x8] sm:$0xff] }
 0x124   : > { %v625_v63 = vadd.f32 %v809_v61, %v616_v60 }
 0x126   : > { %v626_v0 = vadd.f32 %v625_v63, %v624_v62  ;;  %v636_v2 = vmul.f32 %v625_v63, %v625_v63 }
 0x128   : > { %v627_v3 = vrot.slane %v626_v0, 4  ;;  %v637_v4 = vadd.f32 %v636_v2, %v635_v1 }
 0x12a   : > { %v628_v5 = vadd.f32 %v627_v3, %v626_v0  ;;  %v638_v6 = vrot.slane %v637_v4, 4 }
 0x12c   : > { %v629_v7 = vrot.slane %v628_v5, 2  ;;  %v639_v8 = vadd.f32 %v638_v6, %v637_v4 }
 0x12e   : > { %v630_v9 = vadd.f32 %v629_v7, %v628_v5  ;;  %v640_v10 = vrot.slane %v639_v8, 2 }
 0x130   : > { %v631_v11 = vrot.slane %v630_v9, 1  ;;  %v641_v12 = vadd.f32 %v640_v10, %v639_v8 }
 0x132   : > { %v632_v13 = vadd.f32 %v631_v11, %v630_v9  ;;  %v642_v14 = vrot.slane %v641_v12, 1 }
 0x134   : > { %v634_v15 = vmul.f32 0.0625, %v632_v13  ;;  %v643_v16 = vadd.f32 %v642_v14, %v641_v12 }
 0x136   : > { %v644_v17 = vmul.f32 0.0625, %v643_v16  ;;  %v645_v18 = vmul.f32 %v634_v15, %v634_v15  ;;  %v648_v22 = vsub.f32 %v624_v62, %v634_v15  ;;  %v649_v23 = vsub.f32 %v625_v63, %v634_v15 }
 0x138   : > { %v646_v19 = vsub.f32 %v644_v17, %v645_v18 }
 0x13a   : > { %v647_v20 = vmax.f32 %v646_v19, 0.0 }
 0x13c   : > { %v650_v21 = vadd.f32 1e-05, %v647_v20 }
 0x13e   : > { %961 = vrsqrt.f32 %v650_v21 }
 0x14b   : > { %v962_v24 = vpop.eup %961 }
 0x14c   : > { %v652_v25 = vmul.f32 %v962_v24, %v648_v22  ;;  %v653_v26 = vmul.f32 %v962_v24, %v649_v23 }
 0x14e   : > { %vm654_vm0 = vcmp.gt.f32.partialorder %v652_v25, 0.0  ;;  %vm655_vm1 = vcmp.gt.f32.partialorder %v653_v26, 0.0  ;;  %v656_v27 = vmul.f32 0.2, %v652_v25  ;;  %v657_v28 = vmul.f32 0.2, %v653_v26 }
 0x150   : > { %v658_v29 = vsel %vm654_vm0, %v652_v25, %v656_v27  ;;  %v659_v30 = vsel %vm655_vm1, %v653_v26, %v657_v28 }
 0x151   : > { %v820_v31 = vpack.c.bf16 %v659_v30, %v658_v29 }
 0x153   : > { %821 = vst [vmem:[%s1114_s29] sm:$0xff] %v820_v31  }
 0x154 PF: > { %s13_s18 = sadd.s32 1, %s1017_s18   ;;  %s1185_s12 = smov %s997_s13 }
 0x155   : > { %p10_p0 = scmp.ge.s32.totalorder %s13_s18, 6   ;;  %s1186_s13 = smov %s1091_s25 }
 0x156   : > { %s1187_s14 = smov %s1009_s16  ;;  %s1188_s15 = smov %s1013_s17 }
 0x157   : > { %s1189_s16 = smov %s1192_s19  ;;  %s1190_s17 = smov %s1196_s20 }
 0x158   :  { %12 = sbr.rel (!%p10_p0) target bundleno = 4 (0x4), region = 101 }

// kernel: discriminator_forward.8
= control target key start
LH: loop header
LB: loop body
LE: loop exit
PB: predicated region body
PF: predicated region fallthrough
CT: control target
= control target key end

     0   :  { %s1292_s12 = smov 0   ;;  %s1294_s13 = smov 0   ;;  %s1502_s0 = inlined_call_operand.vmem [shape: bf16[2,9,2048], index: 0, kind: input, shape index: {}]   ;;  %s1503_s1 = inlined_call_operand.vmem [shape: bf16[2048,256], index: 1, kind: input, shape index: {}]   ;;  %s1504_s2 = inlined_call_operand.vmem [shape: f32[1,256], index: 2, kind: input, shape index: {}]   ;;  %s1505_s3 = inlined_call_operand.vmem [shape: bf16[2,9,256], index: 3, kind: output, shape index: {}]  }
   0x1   :  { %s1296_s14 = smov 0   ;;  %s1298_s15 = smov 0  }
   0x2   :  { %s1300_s16 = smov 0   ;;  %s1302_s17 = smov 0  }
   0x3   :  { %s1304_s18 = smov 0  }
   0x4 LB: > { %s22_s19 = sadd.s32 1, %s1261_s16  ;;  %s25_s20 = sadd.s32 1, %s1265_s17  ;;  %s1269_s18 = sphi %s1304_s18, %s13_s18   ;;  %s1265_s17 = sphi %s1302_s17, %s1513_s17   ;;  %s1261_s16 = sphi %s1300_s16, %s1512_s16   ;;  %s1257_s15 = sphi %s1298_s15, %s1511_s15   ;;  %s1253_s14 = sphi %s1296_s14, %s1510_s14   ;;  %s1249_s13 = sphi %s1294_s13, %s1509_s13   ;;  %s1245_s12 = sphi %s1292_s12, %s1508_s12  }
   0x5   : > { %p23_p0 = scmp.ge.s32.totalorder %s22_s19, 4  ;;  %p41_p1 = scmp.ne.s32.totalorder %s1249_s13, %s1245_s12 }
   0x6   : > { %p42_p2 = scmp.eq.s32.totalorder %s1269_s18, 0  ;;  %s34_s24 = sadd.s32 1, %s1249_s13 }
   0x7   : > { %s1515_s19 = smov (%p23_p0, %s22_s19), 0  ;;  %s1517_s20 = smov (!%p23_p0, %s25_s20), %s1265_s17 }
   0x8   : > { %p43_p3 = por %p42_p2, %p41_p1  ;;  %p27_p4 = scmp.ge.s32.totalorder %s1517_s20, 2 }
   0x9   : > { %s30_s21 = ssub.s32 %s1261_s16, %s1515_s19  ;;  %p962_p6 = scmp.ge.s32.totalorder %s1269_s18, 8 }
   0xa   : > { %s1519_s20 = smov (%p27_p4, %s1517_s20), 0 }
   0xb   : > { %s29_s22 = ssub.s32 %s1265_s17, %s1519_s20  ;;  %143 = sbr.rel (%p962_p6) target bundleno = 25 (0x19), region = 20 }
   0xc   : > { %s31_s23 = sor.u32 %s30_s21, %s29_s22 }
   0xd   : > { %p32_p5 = scmp.eq.s32.totalorder %s31_s23, 0 }
   0xf   : > { %s1343_s25 = scalar_select %p32_p5, %s1249_s13, %s34_s24  }
  0x10   : > { %146 = sbr.rel (!%p43_p3) target bundleno = 25 (0x19), region = 24  ;;  %s148_s26 = sand.u32 (%p43_p3), 1, %s1249_s13  }
  0x11   : > { %s964_s27 = sshll.u32 (%p43_p3), %s1261_s16, 2  ;;  %s963_s28 = sshll.u32 (%p43_p3), %s148_s26, 5 }
  0x12   : > { %s965_s29 = sshll.u32 (%p43_p3), %s1265_s17, 5  ;;  %s150_s8 = scalar_lea.vmem (%p43_p3), [#allocation3], %s963_s28 }
  0x13   : > { %s153_s30 = sadd.s32 (%p43_p3), %s965_s29, %s964_s27 }
  0x14   : > { %s966_s4 = sshll.u32 (%p43_p3), %s153_s30, 2 }
  0x15   : > { %s155_s7 = scalar_lea.vmem %s1502_s0, %s966_s4 }
  0x16   : > { %v168_v0 = vld [vmem:[%s155_s7] sm:$0xff]  ;;  %v170_v1 = vld [vmem:[%s155_s7 + $0x8] sm:$0xff] }
  0x17   : > { %v172_v2 = vld [vmem:[%s155_s7 + $0x40] sm:$0xff]  ;;  %169 = vst [vmem:[%s150_s8] sm:$0xff] %v168_v0  ;;  %171 = vst [vmem:[%s150_s8 + $0x8] sm:$0xff] %v170_v1  ;;  %v174_v3 = vld [vmem:[%s155_s7 + $0x48] sm:$0xff] }
  0x18   : > { %173 = vst [vmem:[%s150_s8 + $0x10] sm:$0xff] %v172_v2  ;;  %175 = vst [vmem:[%s150_s8 + $0x18] sm:$0xff] %v174_v3 }
  0x19 PF: > { %p967_p7 = scmp.ge.s32.totalorder %s1269_s18, 1  ;;  %p190_p8 = scmp.lt.s32.totalorder %s1269_s18, 9 }
  0x1b   : > { %p191_p9 = pnand %p967_p7, %p190_p8 }
  0x1c   : > { %s197_s9 = sand.u32 (!%p191_p9), 1, %s1245_s12   ;;  %s969_s10 = sshll.u32 (!%p191_p9), %s1253_s14, 6 }
  0x1d   : > { %194 = sbr.rel (%p191_p9) target bundleno = 375 (0x177), region = 51  ;;  %s968_s11 = sshll.u32 (!%p191_p9), %s197_s9, 5 }
  0x1e   : > { %p228_p10 = scmp.lt.s32.totalorder (!%p191_p9), %s969_s10, 255  ;;  %p234_p11 = scmp.lt.s32.totalorder (!%p191_p9), %s1257_s15, 1 }
  0x1f   : > { %s1368_s30 = scalar_lea.vmem (!%p191_p9), [#allocation3], %s968_s11  ;;  %p974_p12 = scmp.ne.s32.totalorder (!%p191_p9), %s1253_s14, 0 }
  0x22   : > { %s1521_s10 = smov (!%p228_p10, %s969_s10), 255  ;;  %s1523_s15 = smov (!%p234_p11, %s1257_s15), 1 }
  0x23   : > { %s1048_s21 = sshll.u32 %s1521_s10, 3  ;;  %s1049_s26 = sshll.u32 %s1523_s15, 4 }
  0x24   : > { %s1361_s24 = scalar_lea.vmem %s1503_s1, %s1048_s21  ;;  %s1366_s29 = scalar_lea.vmem %s1505_s3, %s1049_s26 }
  0x25   : > { %242 = sbr.rel (%p974_p12) target bundleno = 45 (0x2d), region = 59 }
  0x2a   : > { %v1271_v4 = vmov 0.0  }
  0x2b   : > { %243 = vst [vmem:[#allocation2 + $0x10] sm:$0xff] %v1271_v4  ;;  %244 = vst [vmem:[#allocation2] sm:$0xff] %v1271_v4 }
  0x2c   : > { %245 = vst [vmem:[#allocation2 + $0x18] sm:$0x1] %v1271_v4  ;;  %246 = vst [vmem:[#allocation2 + $0x8] sm:$0x1] %v1271_v4 }
  0x2d PF: > { %v1109_v5 = vld [vmem:[%s1361_s24 + $0x74] ss:$8 sps:$4 sm:$0xff]   ;;  %v1113_v7 = vld [vmem:[%s1361_s24 + $0x70] ss:$8 sps:$4 sm:$0xff]   ;;  %v1115_v9 = vld [vmem:[%s1361_s24 + $0x64] ss:$8 sps:$4 sm:$0xff]  }
  0x2e   : > { %v1111_v6 = vld [vmem:[%s1361_s24 + $0x174] ss:$8 sps:$4 sm:$0xff]   ;;  %659 = vmatprep.subr.bf16.mxu0 %v1109_v5  ;;  %v1114_v8 = vld [vmem:[%s1361_s24 + $0x170] ss:$8 sps:$4 sm:$0xff]   ;;  %v1117_v10 = vld [vmem:[%s1361_s24 + $0x164] ss:$8 sps:$4 sm:$0xff]  }
  0x2f   : > { %702 = vmatprep.subr.bf16.mxu1 %v1111_v6  ;;  %660 = vmatpush1.bf16.msra.mxu0 %v1113_v7  ;;  %v1119_v11 = vld [vmem:[%s1361_s24 + $0x60] ss:$8 sps:$4 sm:$0xff]   ;;  %v1121_v13 = vld [vmem:[%s1361_s24 + $0x54] ss:$8 sps:$4 sm:$0xff]   ;;  %v1125_v15 = vld [vmem:[%s1361_s24 + $0x50] ss:$8 sps:$4 sm:$0xff]  }
  0x30   : > { %703 = vmatpush1.bf16.msra.mxu1 %v1114_v8  ;;  %661 = vmatprep.subr.bf16.mxu0 %v1115_v9  ;;  %v1120_v12 = vld [vmem:[%s1361_s24 + $0x160] ss:$8 sps:$4 sm:$0xff]   ;;  %v1123_v14 = vld [vmem:[%s1361_s24 + $0x154] ss:$8 sps:$4 sm:$0xff]   ;;  %v1126_v16 = vld [vmem:[%s1361_s24 + $0x150] ss:$8 sps:$4 sm:$0xff]  }
  0x31   : > { %704 = vmatprep.subr.bf16.mxu1 %v1117_v10  ;;  %v1127_v17 = vld [vmem:[%s1361_s24 + $0x44] ss:$8 sps:$4 sm:$0xff]   ;;  %v1131_v19 = vld [vmem:[%s1361_s24 + $0x40] ss:$8 sps:$4 sm:$0xff]   ;;  %v1133_v21 = vld [vmem:[%s1361_s24 + $0x34] ss:$8 sps:$4 sm:$0xff]  }
  0x32   : > { %v1129_v18 = vld [vmem:[%s1361_s24 + $0x144] ss:$8 sps:$4 sm:$0xff]   ;;  %v1132_v20 = vld [vmem:[%s1361_s24 + $0x140] ss:$8 sps:$4 sm:$0xff]   ;;  %v1135_v22 = vld [vmem:[%s1361_s24 + $0x134] ss:$8 sps:$4 sm:$0xff]  }
  0x33   : > { %662 = vmatpush1.bf16.msra.mxu0 %v1119_v11  ;;  %v1137_v23 = vld [vmem:[%s1361_s24 + $0x30] ss:$8 sps:$4 sm:$0xff]   ;;  %v1139_v25 = vld [vmem:[%s1361_s24 + $0x24] ss:$8 sps:$4 sm:$0xff]   ;;  %v1143_v27 = vld [vmem:[%s1361_s24 + $0x20] ss:$8 sps:$4 sm:$0xff]  }
  0x34   : > { %705 = vmatpush1.bf16.msra.mxu1 %v1120_v12  ;;  %663 = vmatprep.subr.bf16.mxu0 %v1121_v13  ;;  %v1138_v24 = vld [vmem:[%s1361_s24 + $0x130] ss:$8 sps:$4 sm:$0xff]   ;;  %v1141_v26 = vld [vmem:[%s1361_s24 + $0x124] ss:$8 sps:$4 sm:$0xff]   ;;  %v1144_v28 = vld [vmem:[%s1361_s24 + $0x120] ss:$8 sps:$4 sm:$0xff]  }
  0x35   : > { %706 = vmatprep.subr.bf16.mxu1 %v1123_v14  ;;  %v1145_v29 = vld [vmem:[%s1361_s24 + $0x14] ss:$8 sps:$4 sm:$0xff]   ;;  %v1149_v31 = vld [vmem:[%s1361_s24 + $0x10] ss:$8 sps:$4 sm:$0xff]   ;;  %v1151_v33 = vld [vmem:[%s1361_s24 + $0x4] ss:$8 sps:$4 sm:$0xff]  }
  0x36   : > { %v1147_v30 = vld [vmem:[%s1361_s24 + $0x114] ss:$8 sps:$4 sm:$0xff]   ;;  %v1150_v32 = vld [vmem:[%s1361_s24 + $0x110] ss:$8 sps:$4 sm:$0xff]   ;;  %v1153_v34 = vld [vmem:[%s1361_s24 + $0x104] ss:$8 sps:$4 sm:$0xff]  }
  0x37   : > { %664 = vmatpush1.bf16.msra.mxu0 %v1125_v15  ;;  %v1155_v35 = vld [vmem:[%s1361_s24] ss:$8 sps:$4 sm:$0xff]   ;;  %v1157_v37 = vld [vmem:[%s1361_s24 + $0xf4] ss:$8 sps:$4 sm:$0xff]   ;;  %v1161_v39 = vld [vmem:[%s1361_s24 + $0xf0] ss:$8 sps:$4 sm:$0xff]  }
  0x38   : > { %707 = vmatpush1.bf16.msra.mxu1 %v1126_v16  ;;  %665 = vmatprep.subr.bf16.mxu0 %v1127_v17  ;;  %v1156_v36 = vld [vmem:[%s1361_s24 + $0x100] ss:$8 sps:$4 sm:$0xff]   ;;  %v1159_v38 = vld [vmem:[%s1361_s24 + $0x1f4] ss:$8 sps:$4 sm:$0xff]   ;;  %v1162_v40 = vld [vmem:[%s1361_s24 + $0x1f0] ss:$8 sps:$4 sm:$0xff]  }
  0x39   : > { %708 = vmatprep.subr.bf16.mxu1 %v1129_v18  ;;  %v1163_v41 = vld [vmem:[%s1361_s24 + $0xe4] ss:$8 sps:$4 sm:$0xff]   ;;  %v1167_v43 = vld [vmem:[%s1361_s24 + $0xe0] ss:$8 sps:$4 sm:$0xff]   ;;  %v1169_v45 = vld [vmem:[%s1361_s24 + $0xd4] ss:$8 sps:$4 sm:$0xff]  }
  0x3a   : > { %v1165_v42 = vld [vmem:[%s1361_s24 + $0x1e4] ss:$8 sps:$4 sm:$0xff]   ;;  %v1168_v44 = vld [vmem:[%s1361_s24 + $0x1e0] ss:$8 sps:$4 sm:$0xff]   ;;  %v1171_v46 = vld [vmem:[%s1361_s24 + $0x1d4] ss:$8 sps:$4 sm:$0xff]  }
  0x3b   : > { %666 = vmatpush1.bf16.msra.mxu0 %v1131_v19  ;;  %v1173_v47 = vld [vmem:[%s1361_s24 + $0xd0] ss:$8 sps:$4 sm:$0xff]   ;;  %v1175_v49 = vld [vmem:[%s1361_s24 + $0xc4] ss:$8 sps:$4 sm:$0xff]   ;;  %v1179_v51 = vld [vmem:[%s1361_s24 + $0xc0] ss:$8 sps:$4 sm:$0xff]  }
  0x3c   : > { %709 = vmatpush1.bf16.msra.mxu1 %v1132_v20  ;;  %667 = vmatprep.subr.bf16.mxu0 %v1133_v21  ;;  %v1174_v48 = vld [vmem:[%s1361_s24 + $0x1d0] ss:$8 sps:$4 sm:$0xff]   ;;  %v1177_v50 = vld [vmem:[%s1361_s24 + $0x1c4] ss:$8 sps:$4 sm:$0xff]   ;;  %v1180_v52 = vld [vmem:[%s1361_s24 + $0x1c0] ss:$8 sps:$4 sm:$0xff]  }
  0x3d   : > { %710 = vmatprep.subr.bf16.mxu1 %v1135_v22  ;;  %v1181_v53 = vld [vmem:[%s1361_s24 + $0xb4] ss:$8 sps:$4 sm:$0xff]   ;;  %v1185_v57 = vld [vmem:[%s1361_s24 + $0xb0] ss:$8 sps:$4 sm:$0xff]   ;;  %v1187_v59 = vld [vmem:[%s1361_s24 + $0xa4] ss:$8 sps:$4 sm:$0xff]  }
  0x3e   : > { %v1207_v54 = vld [vmem:[%s1368_s30 + $0x4] ss:$16 sps:$4 sm:$0x1f]   ;;  %v1210_v56 = vld [vmem:[%s1368_s30 + $0xc] ss:$16 sps:$4 sm:$0x1f]  }
  0x3f   : > { %668 = vmatpush1.bf16.msra.mxu0 %v1137_v23  ;;  %v1183_v55 = vld [vmem:[%s1361_s24 + $0x1b4] ss:$8 sps:$4 sm:$0xff]   ;;  %691 = vmatprep.mubr.bf16.mxu0 %v1207_v54  ;;  %v1186_v58 = vld [vmem:[%s1361_s24 + $0x1b0] ss:$8 sps:$4 sm:$0xff]   ;;  %v1189_v60 = vld [vmem:[%s1361_s24 + $0x1a4] ss:$8 sps:$4 sm:$0xff]  }
  0x40   : > { %711 = vmatpush1.bf16.msra.mxu1 %v1138_v24  ;;  %669 = vmatprep.subr.bf16.mxu0 %v1139_v25  ;;  %v1191_v61 = vld [vmem:[%s1361_s24 + $0xa0] ss:$8 sps:$4 sm:$0xff]   ;;  %v1193_v63 = vld [vmem:[%s1361_s24 + $0x94] ss:$8 sps:$4 sm:$0xff]   ;;  %v1197_v1 = vld [vmem:[%s1361_s24 + $0x90] ss:$8 sps:$4 sm:$0xff]  }
  0x41   : > { %712 = vmatprep.subr.bf16.mxu1 %v1141_v26  ;;  %734 = vmatprep.mubr.bf16.mxu1 %v1210_v56  ;;  %v1192_v62 = vld [vmem:[%s1361_s24 + $0x1a0] ss:$8 sps:$4 sm:$0xff]   ;;  %v1195_v0 = vld [vmem:[%s1361_s24 + $0x194] ss:$8 sps:$4 sm:$0xff]   ;;  %v1198_v2 = vld [vmem:[%s1361_s24 + $0x190] ss:$8 sps:$4 sm:$0xff]  }
  0x42   : > { %v1199_v3 = vld [vmem:[%s1361_s24 + $0x84] ss:$8 sps:$4 sm:$0xff]   ;;  %v1203_v5 = vld [vmem:[%s1361_s24 + $0x80] ss:$8 sps:$4 sm:$0xff]   ;;  %v247_v10 = vld [vmem:[#allocation2 + $0x10] sm:$0xff]  ;;  %p1043_p13 = scmp.ne.s32.totalorder %s1253_s14, 3 }
  0x43   : > { %670 = vmatpush1.bf16.msra.mxu0 %v1143_v27  ;;  %v1201_v4 = vld [vmem:[%s1361_s24 + $0x184] ss:$8 sps:$4 sm:$0xff]   ;;  %v1204_v6 = vld [vmem:[%s1361_s24 + $0x180] ss:$8 sps:$4 sm:$0xff]   ;;  %v249_v19 = vld [vmem:[#allocation2 + $0x18] sm:$0x1] }
  0x44   : > { %713 = vmatpush1.bf16.msra.mxu1 %v1144_v28  ;;  %671 = vmatprep.subr.bf16.mxu0 %v1145_v29  ;;  %v1205_v7 = vld [vmem:[%s1368_s30] ss:$16 sps:$4 sm:$0x1f]   ;;  %v1208_v8 = vld [vmem:[%s1368_s30 + $0x8] ss:$16 sps:$4 sm:$0x1f]  }
  0x45   : > { %714 = vmatprep.subr.bf16.mxu1 %v1147_v30  ;;  %v248_v14 = vld [vmem:[#allocation2] sm:$0xff]  ;;  %v250_v24 = vld [vmem:[#allocation2 + $0x8] sm:$0x1] }
  0x47   : > { %672 = vmatpush1.bf16.msra.mxu0 %v1149_v31 }
  0x48   : > { %715 = vmatpush1.bf16.msra.mxu1 %v1150_v32  ;;  %673 = vmatprep.subr.bf16.mxu0 %v1151_v33 }
  0x49   : > { %716 = vmatprep.subr.bf16.mxu1 %v1153_v34 }
  0x4b   : > { %674 = vmatpush1.bf16.msra.mxu0 %v1155_v35 }
  0x4c   : > { %717 = vmatpush1.bf16.msra.mxu1 %v1156_v36  ;;  %675 = vmatprep.subr.bf16.mxu0 %v1157_v37 }
  0x4d   : > { %718 = vmatprep.subr.bf16.mxu1 %v1159_v38 }
  0x4f   : > { %676 = vmatpush2.bf16.msra.mxu0 %v1161_v39 }
  0x50   : > { %719 = vmatpush2.bf16.msra.mxu1 %v1162_v40  ;;  %677 = vmatprep.subr.bf16.mxu0 %v1163_v41 }
  0x51   : > { %720 = vmatprep.subr.bf16.mxu1 %v1165_v42 }
  0x53   : > { %678 = vmatpush2.bf16.msra.mxu0 %v1167_v43 }
  0x54   : > { %721 = vmatpush2.bf16.msra.mxu1 %v1168_v44  ;;  %679 = vmatprep.subr.bf16.mxu0 %v1169_v45 }
  0x55   : > { %722 = vmatprep.subr.bf16.mxu1 %v1171_v46 }
  0x57   : > { %680 = vmatpush2.bf16.msra.mxu0 %v1173_v47 }
  0x58   : > { %723 = vmatpush2.bf16.msra.mxu1 %v1174_v48  ;;  %681 = vmatprep.subr.bf16.mxu0 %v1175_v49 }
  0x59   : > { %724 = vmatprep.subr.bf16.mxu1 %v1177_v50 }
  0x5b   : > { %682 = vmatpush2.bf16.msra.mxu0 %v1179_v51 }
  0x5c   : > { %725 = vmatpush2.bf16.msra.mxu1 %v1180_v52  ;;  %683 = vmatprep.subr.bf16.mxu0 %v1181_v53 }
  0x5d   : > { %726 = vmatprep.subr.bf16.mxu1 %v1183_v55 }
  0x5f   : > { %684 = vmatpush2.bf16.msra.mxu0 %v1185_v57 }
  0x60   : > { %727 = vmatpush2.bf16.msra.mxu1 %v1186_v58  ;;  %685 = vmatprep.subr.bf16.mxu0 %v1187_v59 }
  0x61   : > { %728 = vmatprep.subr.bf16.mxu1 %v1189_v60 }
  0x63   : > { %686 = vmatpush2.bf16.msra.mxu0 %v1191_v61 }
  0x64   : > { %729 = vmatpush2.bf16.msra.mxu1 %v1192_v62  ;;  %687 = vmatprep.subr.bf16.mxu0 %v1193_v63 }
  0x65   : > { %730 = vmatprep.subr.bf16.mxu1 %v1195_v0 }
  0x67   : > { %688 = vmatpush2.bf16.msra.mxu0 %v1197_v1 }
  0x68   : > { %731 = vmatpush2.bf16.msra.mxu1 %v1198_v2  ;;  %689 = vmatprep.subr.bf16.mxu0 %v1199_v3 }
  0x69   : > { %732 = vmatprep.subr.bf16.mxu1 %v1201_v4 }
  0x6b   : > { %690 = vmatpush2.bf16.msra.mxu0 %v1203_v5 }
  0x6c   : > { %733 = vmatpush2.bf16.msra.mxu1 %v1204_v6 }
  0x6e   : > { %692 = vmatmul.mubr.bf16.vlgmr.msra.gmra.mxu0 %v1205_v7 }
  0x6f   : > { %735 = vmatmul.mubr.bf16.vlgmr.msra.gmra.mxu1 %v1208_v8 }
 0x12e   : > { %v693_v9 = vpop.f32.mrf.mxu0 }
 0x12f   : > { %v736_v11 = vpop.f32.mrf.mxu1 }
 0x130   : > { %v737_v12 = vadd.f32 %v736_v11, %v693_v9  ;;  %v695_v13 = vpop.f32.mrf.mxu0 }
 0x131   : > { %v738_v15 = vpop.f32.mrf.mxu1 }
 0x132   : > { %v745_v16 = vadd.f32 %v737_v12, %v247_v10  ;;  %v739_v17 = vadd.f32 %v738_v15, %v695_v13  ;;  %v697_v18 = vpop.f32.mrf.mxu0 }
 0x133   : > { %v740_v20 = vpop.f32.mrf.mxu1 }
 0x134   : > { %749 = vst [vmem:[#allocation2 + $0x10] sm:$0xff] %v745_v16  ;;  %v746_v21 = vadd.f32 %v739_v17, %v248_v14  ;;  %v741_v22 = vadd.f32 %v740_v20, %v697_v18  ;;  %v699_v23 = vpop.f32.mrf.mxu0 }
 0x135   : > { %v742_v25 = vpop.f32.mrf.mxu1 }
 0x136   : > { %750 = vst [vmem:[#allocation2] sm:$0xff] %v746_v21  ;;  %v747_v26 = vadd.f32 %v741_v22, %v249_v19  ;;  %v743_v27 = vadd.f32 %v742_v25, %v699_v23  ;;  %756 = sbr.rel (%p1043_p13) target bundleno = 375 (0x177), region = 63 }
 0x138   : > { %751 = vst [vmem:[#allocation2 + $0x18] sm:$0x1] %v747_v26  ;;  %v748_v28 = vadd.f32 %v743_v27, %v250_v24 }
 0x13a   : > { %752 = vst [vmem:[#allocation2 + $0x8] sm:$0x1] %v748_v28 }
 0x13b   : > { %v763_v29 = vlaneseq  ;;  %v761_v31 = vld [vmem:[%s1504_s2] sm:$0x3]  ;;  %v757_v32 = vld [vmem:[#allocation2 + $0x10] sm:$0xff]  ;;  %vm777_vm0 = vcmask 1040384   ;;  %vm863_vm1 = vsmask.f32 256 }
 0x13c   : > { %vm865_vm2 = vcmask 1044484   ;;  %vm866_vm3 = vsmask.f32 4352  ;;  %vm1472_vm4 = vmand %vm777_vm0, %vm863_vm1 }
 0x13d   : > { %v764_v30 = vshrl.u32 %v763_v29, 7  ;;  %v758_v35 = vld [vmem:[#allocation2] sm:$0xff]  ;;  %vm867_vm7 = vmand %vm865_vm2, %vm866_vm3 }
 0x13e   : > { %vm868_vm10 = vmor %vm867_vm7, %vm1472_vm4 }
 0x13f   : > { %v765_v33 = vsub.s32 0, %v764_v30  ;;  %v769_v34 = vsub.s32 1, %v764_v30  ;;  %v759_v36 = vld [vmem:[#allocation2 + $0x18] sm:$0x1] }
 0x141   : > { %v760_v37 = vld [vmem:[#allocation2 + $0x8] sm:$0x1]  ;;  %v766_v38 = vrot.slane %v761_v31, %v765_v33  ;;  %v770_v39 = vrot.slane %v761_v31, %v769_v34 }
 0x143   : > { %v1443_v40 = vadd.f32 %v766_v38, %v757_v32  ;;  %v1445_v41 = vadd.f32 %v770_v39, %v758_v35  ;;  %v1447_v42 = vadd.f32 %v766_v38, %v759_v36  ;;  %v1449_v43 = vadd.f32 %v770_v39, %v760_v37 }
 0x145   : > { %v778_v44 = vsel %vm777_vm0, %v1447_v42, 0.0  ;;  %v786_v45 = vsel %vm777_vm0, %v1449_v43, 0.0  ;;  %v797_v46 = vmul.f32 %v1443_v40, %v1443_v40  ;;  %v798_v47 = vmul.f32 %v1445_v41, %v1445_v41 }
 0x146   : > { %v779_v48 = vadd.f32 %v778_v44, %v1443_v40  ;;  %v787_v49 = vadd.f32 %v786_v45, %v1445_v41  ;;  %v799_v50 = vmul.f32 %v1447_v42, %v1447_v42  ;;  %v800_v51 = vmul.f32 %v1449_v43, %v1449_v43 }
 0x148   : > { %v780_v52 = vrot.slane %v779_v48, 4  ;;  %v788_v53 = vrot.slane %v787_v49, 4  ;;  %v801_v54 = vsel %vm777_vm0, %v799_v50, 0.0  ;;  %v809_v55 = vsel %vm777_vm0, %v800_v51, 0.0 }
 0x149   : > { %v802_v56 = vadd.f32 %v801_v54, %v797_v46  ;;  %v810_v57 = vadd.f32 %v809_v55, %v798_v47  ;;  %v869_v47 = vld [vmem:[%s1366_s29 + $0x8] sm:$0x11] }
 0x14a   : > { %v781_v58 = vadd.f32 %v780_v52, %v779_v48  ;;  %v789_v59 = vadd.f32 %v788_v53, %v787_v49 }
 0x14b   : > { %v803_v60 = vrot.slane %v802_v56, 4  ;;  %v811_v61 = vrot.slane %v810_v57, 4 }
 0x14c   : > { %v782_v62 = vrot.slane %v781_v58, 2  ;;  %v790_v63 = vrot.slane %v789_v59, 2 }
 0x14d   : > { %v804_v0 = vadd.f32 %v803_v60, %v802_v56  ;;  %v812_v1 = vadd.f32 %v811_v61, %v810_v57 }
 0x14e   : > { %v783_v2 = vadd.f32 %v782_v62, %v781_v58  ;;  %v791_v3 = vadd.f32 %v790_v63, %v789_v59 }
 0x14f   : > { %v805_v4 = vrot.slane %v804_v0, 2  ;;  %v813_v5 = vrot.slane %v812_v1, 2 }
 0x150   : > { %v784_v6 = vrot.slane %v783_v2, 1  ;;  %v792_v7 = vrot.slane %v791_v3, 1 }
 0x151   : > { %v806_v8 = vadd.f32 %v805_v4, %v804_v0  ;;  %v814_v9 = vadd.f32 %v813_v5, %v812_v1 }
 0x152   : > { %v785_v10 = vadd.f32 %v784_v6, %v783_v2  ;;  %v793_v11 = vadd.f32 %v792_v7, %v791_v3 }
 0x153   : > { %v807_v12 = vrot.slane %v806_v8, 1  ;;  %v815_v13 = vrot.slane %v814_v9, 1 }
 0x154   : > { %v795_v14 = vmul.f32 0.11111111, %v785_v10  ;;  %v796_v15 = vmul.f32 0.11111111, %v793_v11 }
 0x155   : > { %v808_v16 = vadd.f32 %v807_v12, %v806_v8  ;;  %v816_v17 = vadd.f32 %v815_v13, %v814_v9 }
 0x156   : > { %v819_v18 = vmul.f32 %v795_v14, %v795_v14  ;;  %v820_v19 = vmul.f32 %v796_v15, %v796_v15  ;;  %v825_v28 = vsub.f32 %v1443_v40, %v795_v14  ;;  %v827_v29 = vsub.f32 %v1447_v42, %v795_v14 }
 0x157   : > { %v817_v20 = vmul.f32 0.11111111, %v808_v16  ;;  %v818_v21 = vmul.f32 0.11111111, %v816_v17  ;;  %v826_v30 = vsub.f32 %v1445_v41, %v796_v15  ;;  %v828_v31 = vsub.f32 %v1449_v43, %v796_v15 }
 0x159   : > { %v821_v22 = vsub.f32 %v817_v20, %v819_v18  ;;  %v822_v23 = vsub.f32 %v818_v21, %v820_v19 }
 0x15b   : > { %v823_v24 = vmax.f32 %v821_v22, 0.0  ;;  %v824_v25 = vmax.f32 %v822_v23, 0.0 }
 0x15d   : > { %v829_v26 = vadd.f32 1e-05, %v823_v24  ;;  %v830_v27 = vadd.f32 1e-05, %v824_v25 }
 0x15f   : > { %1211 = vrsqrt.f32 %v829_v26 }
 0x160   : > { %1213 = vrsqrt.f32 %v830_v27 }
 0x16c   : > { %v1212_v32 = vpop.eup %1211 }
 0x16d   : > { %v1214_v33 = vpop.eup %1213  ;;  %v833_v34 = vmul.f32 %v1212_v32, %v825_v28  ;;  %v835_v35 = vmul.f32 %v1212_v32, %v827_v29 }
 0x16e   : > { %v834_v36 = vmul.f32 %v1214_v33, %v826_v30  ;;  %v836_v37 = vmul.f32 %v1214_v33, %v828_v31 }
 0x16f   : > { %vm837_vm5 = vcmp.gt.f32.partialorder %v833_v34, 0.0  ;;  %v841_v39 = vmul.f32 0.2, %v833_v34  ;;  %vm839_vm6 = vcmp.gt.f32.partialorder %v835_v35, 0.0  ;;  %v843_v40 = vmul.f32 0.2, %v835_v35 }
 0x170   : > { %vm838_vm8 = vcmp.gt.f32.partialorder %v834_v36, 0.0  ;;  %v842_v41 = vmul.f32 0.2, %v834_v36  ;;  %vm840_vm9 = vcmp.gt.f32.partialorder %v836_v37, 0.0  ;;  %v844_v42 = vmul.f32 0.2, %v836_v37 }
 0x171   : > { %v845_v43 = vsel %vm837_vm5, %v833_v34, %v841_v39  ;;  %v847_v44 = vsel %vm839_vm6, %v835_v35, %v843_v40 }
 0x172   : > { %v846_v45 = vsel %vm838_vm8, %v834_v36, %v842_v41  ;;  %v848_v46 = vsel %vm840_vm9, %v836_v37, %v844_v42 }
 0x173   : > { %v1050_v48 = vpack.c.bf16 %v846_v45, %v845_v43  ;;  %v1051_v49 = vpack.c.bf16 %v848_v46, %v847_v44 }
 0x175   : > { %861 = vst [vmem:[%s1366_s29] sm:$0xff] %v1050_v48  ;;  %v870_v50 = vsel %vm868_vm10, %v1051_v49, %v869_v47 }
 0x176   : > { %871 = vst [vmem:[%s1366_s29 + $0x8] sm:$0x11] %v870_v50 }
 0x177 PF: > { %s13_s18 = sadd.s32 1, %s1269_s18   ;;  %s1508_s12 = smov %s1249_s13 }
 0x178   : > { %p10_p0 = scmp.ge.s32.totalorder %s13_s18, 10   ;;  %s1509_s13 = smov %s1343_s25 }
 0x179   : > { %s1510_s14 = smov %s1261_s16  ;;  %s1511_s15 = smov %s1265_s17 }
 0x17a   : > { %s1512_s16 = smov %s1515_s19  ;;  %s1513_s17 = smov %s1519_s20 }
 0x17b   :  { %12 = sbr.rel (!%p10_p0) target bundleno = 4 (0x4), region = 101 }

// kernel: discriminator_forward.9
= control target key start
LH: loop header
LB: loop body
LE: loop exit
PB: predicated region body
PF: predicated region fallthrough
CT: control target
= control target key end

     0   :  { %s1239_s0 = inlined_call_operand.vmem [shape: bf16[2,4,4096], index: 0, kind: input, shape index: {}]   ;;  %s1240_s1 = inlined_call_operand.vmem [shape: bf16[4096,1], index: 1, kind: input, shape index: {}]   ;;  %s1241_s2 = inlined_call_operand.<no memory space> [shape: f32[1,1], index: 2, kind: input, shape index: {}]   ;;  %s1242_s3 = inlined_call_operand.vmem [shape: f32[2,1], index: 3, kind: output, shape index: {}]  }
   0x1   :  { %v8_v0 = vstv %s1241_s2 }
   0x2   :  { %9 = vst [vmem:[#allocation3] sm:$0x1] %v8_v0 }
   0x3   :  { %s970_s14 = smov 0   ;;  %s972_s15 = smov 0  }
   0x4   :  { %s974_s16 = smov 0  }
   0x5 LB: > { %s983_s2 = sadd.s32 4294967295, %s944_s16   ;;  %s985_s17 = sadd.s32 1, %s944_s16   ;;  %s944_s16 = sphi %s974_s16, %s1245_s16   ;;  %s940_s15 = sphi %s972_s15, %s1244_s15   ;;  %s936_s14 = sphi %s970_s14, %s1243_s14  }
   0x6   : > { %s19_s18 = ssub.s32 %s944_s16, %s985_s17  ;;  %s22_s19 = sadd.s32 1, %s940_s15 }
   0x7   : > { %p20_p0 = scmp.eq.s32.totalorder %s19_s18, 0  ;;  %p29_p1 = scmp.ne.s32.totalorder %s940_s15, %s936_s14 }
   0x8   : > { %p30_p2 = scmp.eq.s32.totalorder %s944_s16, 0  ;;  %p654_p4 = scmp.ge.s32.totalorder %s944_s16, 8 }
   0x9   : > { %s992_s20 = scalar_select %p20_p0, %s940_s15, %s22_s19  }
   0xa   : > { %p31_p3 = por %p30_p2, %p29_p1  ;;  %126 = sbr.rel (%p654_p4) target bundleno = 21 (0x15), region = 20 }
   0xf   : > { %129 = sbr.rel (!%p31_p3) target bundleno = 21 (0x15), region = 24  ;;  %s131_s21 = sand.u32 (%p31_p3), 1, %s940_s15  }
  0x10   : > { %s667_s22 = sshll.u32 (%p31_p3), %s944_s16, 3  ;;  %s655_s23 = sshll.u32 (%p31_p3), %s131_s21, 4 }
  0x11   : > { %s136_s26 = scalar_lea.vmem (%p31_p3), %s1239_s0, %s667_s22  ;;  %s133_s27 = scalar_lea.vmem (%p31_p3), [#allocation4], %s655_s23 }
  0x12   : > { %v167_v1 = vld [vmem:[%s136_s26] sm:$0xff] (%p31_p3) }
  0x13   : > { %v169_v2 = vld [vmem:[%s136_s26 + $0x40] sm:$0xff] (%p31_p3)  ;;  %168 = vst [vmem:[%s133_s27] sm:$0xff] (%p31_p3), %v167_v1 }
  0x14   : > { %170 = vst [vmem:[%s133_s27 + $0x8] sm:$0xff] %v169_v2 }
  0x15 PF: > { %p658_p5 = scmp.ge.s32.totalorder %s944_s16, 1  ;;  %p184_p6 = scmp.lt.s32.totalorder %s944_s16, 9 }
  0x17   : > { %p185_p7 = pnand %p658_p5, %p184_p6 }
  0x18   : > { %s191_s28 = sand.u32 (!%p185_p7), 1, %s936_s14   ;;  %s660_s29 = sshll.u32 (!%p185_p7), %s983_s2, 6 }
  0x19   : > { %188 = sbr.rel (%p185_p7) target bundleno = 289 (0x121), region = 66  ;;  %s1000_s30 = sshll.u32 (!%p185_p7), %s191_s28, 4 }
  0x1a   : > { %p216_p8 = scmp.lt.s32.totalorder (!%p185_p7), %s660_s29, 511  ;;  %s193_s8 = scalar_lea.vmem (!%p185_p7), [#allocation4], %s1000_s30 }
  0x1b   : > { %p662_p9 = scmp.ne.s32.totalorder (!%p185_p7), %s983_s2, 0 }
  0x1e   : > { %s1247_s29 = smov (!%p216_p8, %s660_s29), 511  ;;  %224 = sbr.rel (%p662_p9) target bundleno = 37 (0x25), region = 74 }
  0x1f   : > { %s661_s4 = sshll.u32 %s1247_s29, 2 }
  0x20   : > { %s1005_s7 = scalar_lea.vmem %s1240_s1, %s661_s4 }
  0x23   : > { %vm225_vm0 = vcmask 1024   ;;  %v946_v3 = vmov 0.0  }
  0x24   : > { %226 = vst.msk [vmem:[#allocation2] sm:$0x3] %vm225_vm0, %v946_v3 }
  0x25 PF: > { %v810_v4 = vld [vmem:[%s1005_s7 + $0x78] sm:$0xff]   ;;  %v809_v12 = vld [vmem:[%s1005_s7 + $0x70] sm:$0xff]   ;;  %v1018_v20 = vld [vmem:[%s1005_s7 + $0x68] sm:$0xff]   ;;  %vm245_vm1 = vcmask 1043456   ;;  %vm439_vm2 = vcmask 1041409   ;;  %vm589_vm3 = vcmask 1024  }
  0x26   : > { %v826_v5 = vld [vmem:[%s1005_s7 + $0xf8] sm:$0xff]   ;;  %v730_v7 = vunpack.c.l.bf16 %v810_v4  ;;  %v731_v8 = vunpack.c.h.bf16 %v810_v4  ;;  %v825_v13 = vld [vmem:[%s1005_s7 + $0xf0] sm:$0xff]   ;;  %v727_v21 = vunpack.c.h.bf16 %v809_v12  ;;  %v1021_v23 = vld [vmem:[%s1005_s7 + $0xe8] sm:$0xff]   ;;  %v726_v28 = vunpack.c.l.bf16 %v809_v12  ;;  %p663_p10 = scmp.ne.s32.totalorder %s983_s2, 7 }
  0x27   : > { %v802_v6 = vld [vmem:[%s1005_s7 + $0x38] sm:$0xff]   ;;  %v794_v9 = vunpack.c.l.bf16 %v826_v5  ;;  %v795_v10 = vunpack.c.h.bf16 %v826_v5  ;;  %v801_v18 = vld [vmem:[%s1005_s7 + $0x30] sm:$0xff]   ;;  %v791_v22 = vunpack.c.h.bf16 %v825_v13  ;;  %v1024_v24 = vld [vmem:[%s1005_s7 + $0x28] sm:$0xff]   ;;  %v790_v29 = vunpack.c.l.bf16 %v825_v13 }
  0x28   : > { %v818_v11 = vld [vmem:[%s1005_s7 + $0xb8] sm:$0xff]   ;;  %v698_v14 = vunpack.c.l.bf16 %v802_v6  ;;  %v699_v15 = vunpack.c.h.bf16 %v802_v6  ;;  %v817_v19 = vld [vmem:[%s1005_s7 + $0xb0] sm:$0xff]   ;;  %827 = vmatprep.subr.mxu0 %v731_v8  ;;  %v1027_v25 = vld [vmem:[%s1005_s7 + $0xa8] sm:$0xff]   ;;  %v695_v26 = vunpack.c.h.bf16 %v801_v18  ;;  %v694_v32 = vunpack.c.l.bf16 %v801_v18 }
  0x29   : > { %v762_v16 = vunpack.c.l.bf16 %v818_v11  ;;  %v763_v17 = vunpack.c.h.bf16 %v818_v11  ;;  %862 = vmatprep.subr.mxu1 %v795_v10  ;;  %v759_v27 = vunpack.c.h.bf16 %v817_v19  ;;  %v1030_v30 = vld [vmem:[%s1005_s7 + $0x60] sm:$0xff]   ;;  %v758_v33 = vunpack.c.l.bf16 %v817_v19  ;;  %v1048_v42 = vld [vmem:[%s1005_s7 + $0x58] sm:$0xff]   ;;  %v1068_v54 = vld [vmem:[%s1005_s7 + $0x50] sm:$0xff]  }
  0x2a   : > { %828 = vmatpush3.msra.mxu0 %v699_v15  ;;  %v1033_v31 = vld [vmem:[%s1005_s7 + $0xe0] sm:$0xff]   ;;  %v723_v34 = vunpack.c.h.bf16 %v1018_v20  ;;  %v787_v35 = vunpack.c.h.bf16 %v1021_v23  ;;  %v691_v38 = vunpack.c.h.bf16 %v1024_v24  ;;  %v755_v39 = vunpack.c.h.bf16 %v1027_v25  ;;  %v1051_v43 = vld [vmem:[%s1005_s7 + $0xd8] sm:$0xff]   ;;  %v1071_v55 = vld [vmem:[%s1005_s7 + $0xd0] sm:$0xff]  }
  0x2b   : > { %863 = vmatpush3.msra.mxu1 %v763_v17  ;;  %829 = vmatprep.subr.mxu0 %v730_v7  ;;  %v1038_v36 = vld [vmem:[%s1005_s7 + $0x20] sm:$0xff]   ;;  %v722_v40 = vunpack.c.l.bf16 %v1018_v20  ;;  %v786_v41 = vunpack.c.l.bf16 %v1021_v23  ;;  %v690_v44 = vunpack.c.l.bf16 %v1024_v24  ;;  %v754_v45 = vunpack.c.l.bf16 %v1027_v25  ;;  %v1058_v48 = vld [vmem:[%s1005_s7 + $0x18] sm:$0xff]   ;;  %v1078_v60 = vld [vmem:[%s1005_s7 + $0x10] sm:$0xff]  }
  0x2c   : > { %864 = vmatprep.subr.mxu1 %v794_v9  ;;  %v1041_v37 = vld [vmem:[%s1005_s7 + $0xa0] sm:$0xff]   ;;  %830 = vmatpush3.msra.mxu0 %v698_v14  ;;  %v719_v46 = vunpack.c.h.bf16 %v1030_v30  ;;  %v783_v47 = vunpack.c.h.bf16 %v1033_v31  ;;  %v1061_v49 = vld [vmem:[%s1005_s7 + $0x98] sm:$0xff]   ;;  %v687_v50 = vunpack.c.h.bf16 %v1038_v36  ;;  %v718_v52 = vunpack.c.l.bf16 %v1030_v30  ;;  %v1081_v61 = vld [vmem:[%s1005_s7 + $0x90] sm:$0xff]  }
  0x2d   : > { %865 = vmatpush3.msra.mxu1 %v762_v16  ;;  %831 = vmatprep.subr.mxu0 %v727_v21  ;;  %v751_v51 = vunpack.c.h.bf16 %v1041_v37  ;;  %v782_v53 = vunpack.c.l.bf16 %v1033_v31  ;;  %v686_v56 = vunpack.c.l.bf16 %v1038_v36  ;;  %v750_v57 = vunpack.c.l.bf16 %v1041_v37  ;;  %v1088_v2 = vld [vmem:[%s1005_s7 + $0x48] sm:$0xff]   ;;  %v1108_v14 = vld [vmem:[%s1005_s7 + $0x40] sm:$0xff]  }
  0x2e   : > { %866 = vmatprep.subr.mxu1 %v791_v22  ;;  %832 = vmatpush3.msra.mxu0 %v695_v26  ;;  %v715_v58 = vunpack.c.h.bf16 %v1048_v42  ;;  %v779_v59 = vunpack.c.h.bf16 %v1051_v43  ;;  %v683_v62 = vunpack.c.h.bf16 %v1058_v48  ;;  %v747_v63 = vunpack.c.h.bf16 %v1061_v49  ;;  %v1091_v3 = vld [vmem:[%s1005_s7 + $0xc8] sm:$0xff]   ;;  %v1111_v15 = vld [vmem:[%s1005_s7 + $0xc0] sm:$0xff]  }
  0x2f   : > { %867 = vmatpush3.msra.mxu1 %v759_v27  ;;  %833 = vmatprep.subr.mxu0 %v726_v28  ;;  %v714_v0 = vunpack.c.l.bf16 %v1048_v42  ;;  %v778_v1 = vunpack.c.l.bf16 %v1051_v43  ;;  %v682_v4 = vunpack.c.l.bf16 %v1058_v48  ;;  %v746_v5 = vunpack.c.l.bf16 %v1061_v49  ;;  %v1098_v8 = vld [vmem:[%s1005_s7 + $0x8] sm:$0xff]   ;;  %v1118_v20 = vld [vmem:[%s1005_s7] sm:$0xff]  }
  0x30   : > { %868 = vmatprep.subr.mxu1 %v790_v29  ;;  %834 = vmatpush3.msra.mxu0 %v694_v32  ;;  %v711_v6 = vunpack.c.h.bf16 %v1068_v54  ;;  %v775_v7 = vunpack.c.h.bf16 %v1071_v55  ;;  %v1101_v9 = vld [vmem:[%s1005_s7 + $0x88] sm:$0xff]   ;;  %v679_v10 = vunpack.c.h.bf16 %v1078_v60  ;;  %v743_v11 = vunpack.c.h.bf16 %v1081_v61  ;;  %v1121_v21 = vld [vmem:[%s1005_s7 + $0x80] sm:$0xff]  }
  0x31   : > { %869 = vmatpush3.msra.mxu1 %v758_v33  ;;  %835 = vmatprep.subr.mxu0 %v723_v34  ;;  %v710_v12 = vunpack.c.l.bf16 %v1068_v54  ;;  %v774_v13 = vunpack.c.l.bf16 %v1071_v55  ;;  %v678_v16 = vunpack.c.l.bf16 %v1078_v60  ;;  %v742_v17 = vunpack.c.l.bf16 %v1081_v61  ;;  %v227_v22 = vld [vmem:[%s193_s8] sm:$0xff]  ;;  %v228_v27 = vld [vmem:[%s193_s8 + $0x8] sm:$0xff] }
  0x32   : > { %870 = vmatprep.subr.mxu1 %v787_v35  ;;  %836 = vmatpush3.msra.mxu0 %v691_v38  ;;  %v707_v18 = vunpack.c.h.bf16 %v1088_v2  ;;  %v771_v19 = vunpack.c.h.bf16 %v1091_v3  ;;  %v675_v23 = vunpack.c.h.bf16 %v1098_v8  ;;  %v739_v24 = vunpack.c.h.bf16 %v1101_v9 }
  0x33   : > { %871 = vmatpush3.msra.mxu1 %v755_v39  ;;  %837 = vmatprep.subr.mxu0 %v722_v40  ;;  %v706_v25 = vunpack.c.l.bf16 %v1088_v2  ;;  %v770_v26 = vunpack.c.l.bf16 %v1091_v3  ;;  %v674_v28 = vunpack.c.l.bf16 %v1098_v8  ;;  %v738_v29 = vunpack.c.l.bf16 %v1101_v9 }
  0x34   : > { %872 = vmatprep.subr.mxu1 %v786_v41  ;;  %838 = vmatpush3.msra.mxu0 %v690_v44  ;;  %v703_v32 = vunpack.c.h.bf16 %v1108_v14  ;;  %v767_v33 = vunpack.c.h.bf16 %v1111_v15  ;;  %v671_v34 = vunpack.c.h.bf16 %v1118_v20  ;;  %v735_v35 = vunpack.c.h.bf16 %v1121_v21 }
  0x35   : > { %873 = vmatpush3.msra.mxu1 %v754_v45  ;;  %839 = vmatprep.subr.mxu0 %v719_v46  ;;  %v702_v38 = vunpack.c.l.bf16 %v1108_v14  ;;  %v229_v39 = vunpack.c.l.bf16 %v227_v22  ;;  %v766_v40 = vunpack.c.l.bf16 %v1111_v15  ;;  %v231_v41 = vunpack.c.l.bf16 %v228_v27 }
  0x36   : > { %874 = vmatprep.subr.mxu1 %v783_v47  ;;  %840 = vmatpush3.msra.mxu0 %v687_v50  ;;  %v230_v44 = vunpack.c.h.bf16 %v227_v22  ;;  %v232_v45 = vunpack.c.h.bf16 %v228_v27  ;;  %v670_v46 = vunpack.c.l.bf16 %v1118_v20  ;;  %v734_v30 = vunpack.c.l.bf16 %v1121_v21 }
  0x37   : > { %875 = vmatpush3.msra.mxu1 %v751_v51  ;;  %841 = vmatprep.subr.mxu0 %v718_v52  ;;  %v237_v47 = vcombine.high %v229_v39, %v229_v39  ;;  %v246_v50 = vsel %vm245_vm1, %v229_v39, 0.0  ;;  %v239_v31 = vcombine.high %v231_v41, %v231_v41 }
  0x38   : > { %876 = vmatprep.subr.mxu1 %v782_v53  ;;  %842 = vmatpush3.msra.mxu0 %v686_v56  ;;  %v238_v51 = vcombine.high %v230_v44, %v230_v44  ;;  %v240_v36 = vcombine.high %v232_v45, %v232_v45  ;;  %v247_v52 = vrot.slane %v246_v50, 4  ;;  %v274_v53 = vsel %vm245_vm1, %v231_v41, 0.0 }
  0x39   : > { %877 = vmatpush3.msra.mxu1 %v750_v57  ;;  %843 = vmatprep.subr.mxu0 %v715_v58  ;;  %v253_v37 = vsel %vm245_vm1, %v237_v47, 0.0  ;;  %v260_v56 = vsel %vm245_vm1, %v230_v44, 0.0  ;;  %v288_v57 = vsel %vm245_vm1, %v232_v45, 0.0 }
  0x3a   : > { %878 = vmatprep.subr.mxu1 %v779_v59  ;;  %844 = vmatpush3.msra.mxu0 %v683_v62  ;;  %v254_v58 = vrot.slane %v253_v37, 4  ;;  %v281_v59 = vsel %vm245_vm1, %v239_v31, 0.0  ;;  %v267_v62 = vsel %vm245_vm1, %v238_v51, 0.0  ;;  %v261_v39 = vrot.slane %v260_v56, 4 }
  0x3b   : > { %879 = vmatpush3.msra.mxu1 %v747_v63  ;;  %845 = vmatprep.subr.mxu0 %v714_v0  ;;  %v295_v63 = vsel %vm245_vm1, %v240_v36, 0.0  ;;  %v282_v22 = vrot.slane %v281_v59, 4  ;;  %v268_v27 = vrot.slane %v267_v62, 4  ;;  %v248_v0 = vadd.f32 %v247_v52, %v246_v50 }
  0x3c   : > { %880 = vmatprep.subr.mxu1 %v778_v1  ;;  %846 = vmatpush3.msra.mxu0 %v682_v4  ;;  %v296_v42 = vrot.slane %v295_v63, 4  ;;  %v255_v43 = vadd.f32 %v254_v58, %v253_v37  ;;  %v275_v1 = vrot.slane %v274_v53, 4  ;;  %v289_v41 = vrot.slane %v288_v57, 4 }
  0x3d   : > { %881 = vmatpush3.msra.mxu1 %v746_v5  ;;  %847 = vmatprep.subr.mxu0 %v711_v6  ;;  %v283_v48 = vadd.f32 %v282_v22, %v281_v59  ;;  %v269_v49 = vadd.f32 %v268_v27, %v267_v62  ;;  %v249_v5 = vrot.slane %v248_v0, 2  ;;  %v262_v44 = vadd.f32 %v261_v39, %v260_v56  ;;  %v302_v56 = vld [vmem:[#allocation2] sm:$0x3] }
  0x3e   : > { %882 = vmatprep.subr.mxu1 %v775_v7  ;;  %848 = vmatpush3.msra.mxu0 %v679_v10  ;;  %v297_v4 = vadd.f32 %v296_v42, %v295_v63  ;;  %v256_v6 = vrot.slane %v255_v43, 2  ;;  %v276_v7 = vadd.f32 %v275_v1, %v274_v53  ;;  %v290_v45 = vadd.f32 %v289_v41, %v288_v57 }
  0x3f   : > { %883 = vmatpush3.msra.mxu1 %v743_v11  ;;  %849 = vmatprep.subr.mxu0 %v710_v12  ;;  %v284_v10 = vrot.slane %v283_v48, 2  ;;  %v270_v11 = vrot.slane %v269_v49, 2  ;;  %v250_v50 = vadd.f32 %v249_v5, %v248_v0  ;;  %v263_v12 = vrot.slane %v262_v44, 2 }
  0x40   : > { %884 = vmatprep.subr.mxu1 %v774_v13  ;;  %850 = vmatpush3.msra.mxu0 %v678_v16  ;;  %v298_v47 = vrot.slane %v297_v4, 2  ;;  %v257_v54 = vadd.f32 %v256_v6, %v255_v43  ;;  %v277_v55 = vrot.slane %v276_v7, 2  ;;  %v291_v13 = vrot.slane %v290_v45, 2 }
  0x41   : > { %885 = vmatpush3.msra.mxu1 %v742_v17  ;;  %851 = vmatprep.subr.mxu0 %v707_v18  ;;  %v285_v60 = vadd.f32 %v284_v10, %v283_v48  ;;  %v271_v61 = vadd.f32 %v270_v11, %v269_v49  ;;  %v251_v17 = vrot.slane %v250_v50, 1  ;;  %v264_v31 = vadd.f32 %v263_v12, %v262_v44 }
  0x42   : > { %886 = vmatprep.subr.mxu1 %v771_v19  ;;  %852 = vmatpush3.msra.mxu0 %v675_v23  ;;  %v299_v16 = vadd.f32 %v298_v47, %v297_v4  ;;  %v258_v18 = vrot.slane %v257_v54, 1  ;;  %v278_v19 = vadd.f32 %v277_v55, %v276_v7  ;;  %v292_v51 = vadd.f32 %v291_v13, %v290_v45 }
  0x43   : > { %887 = vmatpush3.msra.mxu1 %v739_v24  ;;  %853 = vmatprep.subr.mxu0 %v706_v25  ;;  %v286_v23 = vrot.slane %v285_v60, 1  ;;  %v272_v24 = vrot.slane %v271_v61, 1  ;;  %v252_v52 = vadd.f32 %v251_v17, %v250_v50  ;;  %v265_v25 = vrot.slane %v264_v31, 1 }
  0x44   : > { %888 = vmatprep.subr.mxu1 %v770_v26  ;;  %854 = vmatpush3.msra.mxu0 %v674_v28  ;;  %v300_v36 = vrot.slane %v299_v16, 1  ;;  %v259_v2 = vadd.f32 %v258_v18, %v257_v54  ;;  %v279_v3 = vrot.slane %v278_v19, 1  ;;  %v293_v26 = vrot.slane %v292_v51, 1 }
  0x45   : > { %889 = vmatpush3.msra.mxu1 %v738_v29  ;;  %855 = vmatprep.subr.mxu0 %v703_v32  ;;  %v287_v8 = vadd.f32 %v286_v23, %v285_v60  ;;  %v273_v9 = vadd.f32 %v272_v24, %v271_v61  ;;  %v266_v32 = vadd.f32 %v265_v25, %v264_v31 }
  0x46   : > { %890 = vmatprep.subr.mxu1 %v767_v33  ;;  %856 = vmatpush3.msra.mxu0 %v671_v34  ;;  %v301_v28 = vadd.f32 %v300_v36, %v299_v16  ;;  %v280_v29 = vadd.f32 %v279_v3, %v278_v19  ;;  %v294_v33 = vadd.f32 %v293_v26, %v292_v51 }
  0x47   : > { %891 = vmatpush3.msra.mxu1 %v735_v35  ;;  %857 = vmatprep.subr.mxu0 %v702_v38  ;;  %v441_v34 = vsel %vm439_vm2, %v287_v8, %v259_v2 }
  0x48   : > { %892 = vmatprep.subr.mxu1 %v766_v40  ;;  %858 = vmatpush3.msra.mxu0 %v670_v46  ;;  %v443_v35 = vsel %vm439_vm2, %v301_v28, %v273_v9  ;;  %v440_v14 = vsel %vm439_vm2, %v280_v29, %v252_v52  ;;  %v442_v15 = vsel %vm439_vm2, %v294_v33, %v266_v32 }
  0x49   : > { %893 = vmatpush3.msra.mxu1 %v734_v30  ;;  %512 = vmatprep.mubr.f32.mxu0 %v441_v34 }
  0x4a   : > { %582 = vmatprep.mubr.f32.mxu1 %v443_v35  ;;  %513 = vmatmul.mubr.f32.vlgmr.msra.gmra.mxu0 %v440_v14 }
  0x4b   : > { %583 = vmatmul.mubr.f32.vlgmr.msra.gmra.mxu1 %v442_v15 }
 0x10a   : > { %v859_v38 = vpop.f32.mrf.mxu0 }
 0x10b   : > { %v894_v40 = vpop.f32.mrf.mxu1 }
 0x10c   : > { %v860_v37 = vpop.f32.mrf.mxu0 }
 0x10d   : > { %v895_v20 = vpop.f32.mrf.mxu1  ;;  %v861_v46 = vadd.f32 %v860_v37, %v859_v38 }
 0x10e   : > { %v896_v53 = vadd.f32 %v895_v20, %v894_v40 }
 0x110   : > { %v585_v57 = vadd.f32 %v896_v53, %v861_v46  ;;  %594 = sbr.rel (%p663_p10) target bundleno = 289 (0x121), region = 78 }
 0x112   : > { %v588_v21 = vadd.f32 %v585_v57, %v302_v56 }
 0x114   : > { %590 = vst.msk [vmem:[#allocation2] sm:$0x3] %vm589_vm3, %v588_v21 }
 0x115   : > { %v664_v58 = vld [vmem:[#allocation3] ss:$0 sm:$0xff] }
 0x11b   : > { %v595_v30 = vld [vmem:[#allocation2] sm:$0x3] }
 0x11c   : > { %v596_v59 = vmul.f32 0.25, %v595_v30 }
 0x11e   : > { %v604_v62 = vadd.f32 %v664_v58, %v596_v59 }
 0x120   : > { %605 = vst.msk [vmem:[%s1242_s3] sm:$0x3] %vm589_vm3, %v604_v62 }
 0x121 PF: > { %p12_p11 = scmp.ge.s32.totalorder %s985_s17, 10   ;;  %s1243_s14 = smov %s940_s15 }
 0x122   : > { %s1244_s15 = smov %s992_s20  ;;  %s1245_s16 = smov %s985_s17 }
 0x123   :  { %14 = sbr.rel (!%p12_p11) target bundleno = 5 (0x5), region = 112 }

</bundles_post_ra>
